<compile_context>
chip_gen: v7x
topology: tpu7x:2x2x1
jax: 0.10.0
libtpu: 0.0.40
codegen_flags: <defaults>
</compile_context>

<pallas_src>
import functools

import jax
import jax.numpy as jnp
from jax.experimental import pallas as pl
from jax.experimental.pallas import tpu as pltpu


def _round_up(x, m):
    return ((x + m - 1) // m) * m


def ntm_kernel(
    x_ref,        # (TILE_B, V)
    w_enc1_ref,   # (V, 2H)   = [fc11_w.T | fcs_w.T]
    w12_ref,      # (H, H)
    w_mulv_ref,   # (H, 2T)   = [fc21_w.T | fc22_w.T]
    wg_ref,       # (4, T, T) stacked fcg1..fcg4 (transposed)
    wd1_ref,      # (T, V)
    b_ref,        # (8, bias_lane) row-packed biases, each row at lane offset 0
    out_ref,      # (TILE_B, out_width) packed [mu | logvar | g | d | pad]
    *,
    hidden, topic, input_dim,
):
    x = x_ref[...]
    tile_b = x.shape[0]

    def mm(a, w):
        return jnp.dot(a, w, preferred_element_type=jnp.float32)

    # --- row-packed biases: sublane-row reads at lane offset 0 (no rotates) ---
    b11 = b_ref[0:1, 0:hidden]
    b12 = b_ref[1:2, 0:hidden]
    b_mulv = b_ref[2:3, 0:2 * topic]
    bg = [b_ref[3 + i:4 + i, 0:topic] for i in range(4)]
    bd1 = b_ref[7:8, 0:input_dim]

    # ---- encode: fused fc11 | fcs -> single MXU push; bias only on fc11 half ----
    enc1 = mm(x, w_enc1_ref[...])                    # (TILE_B, 2H)
    h = jax.nn.relu(enc1[:, :hidden] + b11)          # relu(fc11(x))
    skip = enc1[:, hidden:]                          # fcs(x) (bias-free)
    e1 = jax.nn.relu(mm(h, w12_ref[...]) + b12) + skip

    # ---- fused fc21 | fc22 -> [mu | logvar] ----
    mulv = mm(e1, w_mulv_ref[...]) + b_mulv          # (TILE_B, 2T)
    mu = mulv[:, :topic]

    # ---- reparameterize (eval): z = mu ----
    # TODO(synk): training-mode reparameterize (eps ~ N(0,1)) not implemented.

    # ---- generate ----
    h = mu
    for i in range(4):
        h = jnp.tanh(mm(h, wg_ref[i]) + bg[i])
    g = h + mu

    # ---- decode: softmax over feature dim (dim=1), exact divide ----
    logits = mm(g, wd1_ref[...]) + bd1
    logits = logits - jnp.max(logits, axis=1, keepdims=True)
    p = jnp.exp(logits)
    d = p / jnp.sum(p, axis=1, keepdims=True)

    # ---- single unmasked full-width store of the packed output row ----
    pieces = [mulv, g, d]
    pad = out_ref.shape[1] - (3 * topic + input_dim)
    if pad > 0:
        pieces.append(jnp.zeros((tile_b, pad), jnp.float32))
    out_ref[...] = jnp.concatenate(pieces, axis=1)


def prepare_ntm_params(params):
    """One-time fusion / transposition of PyTorch-layout (out, in) weights."""
    f32 = lambda a: jnp.asarray(a, jnp.float32)
    w11 = f32(params["fc11_w"])      # (H, V)
    ws = f32(params["fcs_w"])        # (H, V)
    w12 = f32(params["fc12_w"])      # (H, H)
    w21 = f32(params["fc21_w"])      # (T, H)
    w22 = f32(params["fc22_w"])      # (T, H)
    wd1 = f32(params["fcd1_w"])      # (V, T)
    hidden = w11.shape[0]
    topic = w21.shape[0]
    input_dim = w11.shape[1]

    # biases packed one-per-sublane-row, lane offset 0, zero-padded to 128 lanes
    bias_lane = _round_up(max(hidden, 2 * topic, input_dim, 128), 128)

    def row(vec):
        vec = f32(vec)
        return jnp.pad(vec, (0, bias_lane - vec.shape[0]))

    bias = jnp.stack([
        row(params["fc11_b"]),
        row(params["fc12_b"]),
        row(jnp.concatenate([f32(params["fc21_b"]), f32(params["fc22_b"])])),
        row(params["fcg1_b"]),
        row(params["fcg2_b"]),
        row(params["fcg3_b"]),
        row(params["fcg4_b"]),
        row(params["fcd1_b"]),
    ])                                                               # (8, 128)

    return {
        "w_enc1": jnp.concatenate([w11.T, ws.T], axis=1),            # (V, 2H)
        "w12": w12.T,                                                # (H, H)
        "w_mulv": jnp.concatenate([w21.T, w22.T], axis=1),           # (H, 2T)
        "wg": jnp.stack([f32(params[f"fcg{i}_w"]).T for i in (1, 2, 3, 4)]),  # (4,T,T)
        "wd1": wd1.T,                                                # (T, V)
        "bias": bias,                                                # (8, 128)
    }


def ntm_forward(x, prep, *, tile_b=128):
    """x: (B, input_dim) float32.  prep: output of prepare_ntm_params()."""
    hidden = prep["w12"].shape[0]
    topic = prep["w_mulv"].shape[1] // 2
    input_dim = prep["wd1"].shape[1]
    B = x.shape[0]

    # pad batch to a TILE_B multiple so the grid is exact; slice back below
    bp = _round_up(max(B, 1), tile_b)
    if bp != B:
        x = jnp.pad(x, ((0, bp - B), (0, 0)))

    out_width = _round_up(3 * topic + input_dim, 128)   # lane-dense output row
    grid = (pl.cdiv(bp, tile_b),)

    const2 = lambda i: (0, 0)        # weights/biases: VMEM-resident across grid
    const3 = lambda i: (0, 0, 0)
    kernel = functools.partial(
        ntm_kernel, hidden=hidden, topic=topic, input_dim=input_dim)

    packed = pl.pallas_call(
        kernel,
        out_shape=jax.ShapeDtypeStruct((bp, out_width), jnp.float32),
        grid_spec=pltpu.PrefetchScalarGridSpec(
            num_scalar_prefetch=0,
            grid=grid,
            in_specs=[
                pl.BlockSpec((tile_b, input_dim), lambda i: (i, 0)),   # x tile
                pl.BlockSpec(prep["w_enc1"].shape, const2),
                pl.BlockSpec(prep["w12"].shape, const2),
                pl.BlockSpec(prep["w_mulv"].shape, const2),
                pl.BlockSpec(prep["wg"].shape, const3),
                pl.BlockSpec(prep["wd1"].shape, const2),
                pl.BlockSpec(prep["bias"].shape, const2),
            ],
            out_specs=pl.BlockSpec((tile_b, out_width), lambda i: (i, 0)),
        ),
        compiler_params=pltpu.CompilerParams(
            dimension_semantics=("parallel",)),
    )(
        x, prep["w_enc1"], prep["w12"], prep["w_mulv"],
        prep["wg"], prep["wd1"], prep["bias"],
    )

    mu = packed[:B, 0:topic]
    logvar = packed[:B, topic:2 * topic]
    g = packed[:B, 2 * topic:3 * topic]
    d = packed[:B, 3 * topic:3 * topic + input_dim]
    z = mu   # eval-mode reparameterize
    return z, g, d, mu, logvar


def make_params(key, input_dim, hidden, topic):
    """Deterministic synthetic parameters in PyTorch nn.Linear layout (out, in)."""
    ks = iter(jax.random.split(key, 32))

    def lin(out_d, in_d, bias=True):
        bound = 1.0 / jnp.sqrt(in_d)
        w = jax.random.uniform(next(ks), (out_d, in_d), jnp.float32, -bound, bound)
        b = jax.random.uniform(next(ks), (out_d,), jnp.float32, -bound, bound) if bias else None
        return w, b

    p = {}
    p["fc11_w"], p["fc11_b"] = lin(hidden, input_dim)
    p["fc12_w"], p["fc12_b"] = lin(hidden, hidden)
    p["fc21_w"], p["fc21_b"] = lin(topic, hidden)
    p["fc22_w"], p["fc22_b"] = lin(topic, hidden)
    p["fcs_w"], _ = lin(hidden, input_dim, bias=False)
    p["fcg1_w"], p["fcg1_b"] = lin(topic, topic)
    p["fcg2_w"], p["fcg2_b"] = lin(topic, topic)
    p["fcg3_w"], p["fcg3_b"] = lin(topic, topic)
    p["fcg4_w"], p["fcg4_b"] = lin(topic, topic)
    p["fcd1_w"], p["fcd1_b"] = lin(input_dim, topic)
    return p


def ntm_forward_ref(x, params):
    """Pure-JAX reference for correctness check."""
    def lin(h, w, b=None):
        y = h @ w.T
        return y if b is None else y + b

    e1 = jax.nn.relu(lin(x, params["fc11_w"], params["fc11_b"]))
    e1 = jax.nn.relu(lin(e1, params["fc12_w"], params["fc12_b"]))
    e1 = e1 + lin(x, params["fcs_w"])
    mu = lin(e1, params["fc21_w"], params["fc21_b"])
    logvar = lin(e1, params["fc22_w"], params["fc22_b"])
    z = mu
    h = jnp.tanh(lin(z, params["fcg1_w"], params["fcg1_b"]))
    h = jnp.tanh(lin(h, params["fcg2_w"], params["fcg2_b"]))
    h = jnp.tanh(lin(h, params["fcg3_w"], params["fcg3_b"]))
    h = jnp.tanh(lin(h, params["fcg4_w"], params["fcg4_b"]))
    g = h + z
    d = jax.nn.softmax(lin(g, params["fcd1_w"], params["fcd1_b"]), axis=1)
    return z, g, d, mu, logvar


if __name__ == "__main__":
    # opt.class_size = 32 (flag=1 input_dim), opt.n_hidden = 32, opt.topic_num = 16
    # B=200 deliberately not a multiple of TILE_B=128 to exercise the padding path.
    B, INPUT_DIM, HIDDEN, TOPIC = 200, 32, 32, 16

    key = jax.random.PRNGKey(0)
    kx, kp = jax.random.split(key)
    x = jax.random.uniform(kx, (B, INPUT_DIM), jnp.float32)
    params = make_params(kp, INPUT_DIM, HIDDEN, TOPIC)

    prep = prepare_ntm_params(params)          # one-time weight fusion / transpose
    fwd = jax.jit(ntm_forward)

    outs = jax.block_until_ready(fwd(x, prep))
    refs = ntm_forward_ref(x, params)

    names = ("z", "g", "d", "mu", "logvar")
    for name, o, r in zip(names, outs, refs):
        assert o.shape == r.shape and o.dtype == r.dtype
        err = float(jnp.max(jnp.abs(o - r)))
        assert err < 1e-4, f"{name} mismatch vs reference: {err}"

    print("KERNEL_OK")
</pallas_src>

<mosaic_0001>
module attributes {stable_mosaic.version = 11 : i64} {
  func.func @ntm_kernel(%arg0: i32, %arg1: memref<128x32xf32, #tpu.memory_space<vmem>>, %arg2: memref<32x64xf32, #tpu.memory_space<vmem>>, %arg3: memref<32x32xf32, #tpu.memory_space<vmem>>, %arg4: memref<32x32xf32, #tpu.memory_space<vmem>>, %arg5: memref<4x16x16xf32, #tpu.memory_space<vmem>>, %arg6: memref<16x32xf32, #tpu.memory_space<vmem>>, %arg7: memref<8x128xf32, #tpu.memory_space<vmem>>, %arg8: memref<128x128xf32, #tpu.memory_space<vmem>>) attributes {dimension_semantics = [#tpu.dimension_semantics<parallel>], iteration_bounds = array<i64: 2>, scalar_prefetch = 0 : i64, scratch_operands = 0 : i64, tpu.core_type = #tpu.core_type<tc>, window_params = [{transform_indices = @transform_0, window_bounds = array<i64: 128, 32>}, {pipeline_mode = #tpu.pipeline_mode<synchronous>, transform_indices = @transform_1, window_bounds = array<i64: 32, 64>}, {pipeline_mode = #tpu.pipeline_mode<synchronous>, transform_indices = @transform_2, window_bounds = array<i64: 32, 32>}, {pipeline_mode = #tpu.pipeline_mode<synchronous>, transform_indices = @transform_3, window_bounds = array<i64: 32, 32>}, {pipeline_mode = #tpu.pipeline_mode<synchronous>, transform_indices = @transform_4, window_bounds = array<i64: 4, 16, 16>}, {pipeline_mode = #tpu.pipeline_mode<synchronous>, transform_indices = @transform_5, window_bounds = array<i64: 16, 32>}, {pipeline_mode = #tpu.pipeline_mode<synchronous>, transform_indices = @transform_6, window_bounds = array<i64: 8, 128>}, {transform_indices = @transform_7, window_bounds = array<i64: 128, 128>}]} {
    %c0 = arith.constant 0 : index
    %c0_0 = arith.constant 0 : index
    %0 = vector.load %arg1[%c0, %c0_0] : memref<128x32xf32, #tpu.memory_space<vmem>>, vector<128x32xf32>
    %c0_1 = arith.constant 0 : index
    %c0_2 = arith.constant 0 : index
    %1 = vector.load %arg7[%c0_1, %c0_2] : memref<8x128xf32, #tpu.memory_space<vmem>>, vector<1x32xf32>
    %c1 = arith.constant 1 : index
    %c0_3 = arith.constant 0 : index
    %2 = vector.load %arg7[%c1, %c0_3] : memref<8x128xf32, #tpu.memory_space<vmem>>, vector<1x32xf32>
    %c2 = arith.constant 2 : index
    %c0_4 = arith.constant 0 : index
    %3 = vector.load %arg7[%c2, %c0_4] : memref<8x128xf32, #tpu.memory_space<vmem>>, vector<1x32xf32>
    %c3 = arith.constant 3 : index
    %c0_5 = arith.constant 0 : index
    %4 = vector.load %arg7[%c3, %c0_5] : memref<8x128xf32, #tpu.memory_space<vmem>>, vector<1x16xf32>
    %c4 = arith.constant 4 : index
    %c0_6 = arith.constant 0 : index
    %5 = vector.load %arg7[%c4, %c0_6] : memref<8x128xf32, #tpu.memory_space<vmem>>, vector<1x16xf32>
    %c5 = arith.constant 5 : index
    %c0_7 = arith.constant 0 : index
    %6 = vector.load %arg7[%c5, %c0_7] : memref<8x128xf32, #tpu.memory_space<vmem>>, vector<1x16xf32>
    %c6 = arith.constant 6 : index
    %c0_8 = arith.constant 0 : index
    %7 = vector.load %arg7[%c6, %c0_8] : memref<8x128xf32, #tpu.memory_space<vmem>>, vector<1x16xf32>
    %c7 = arith.constant 7 : index
    %c0_9 = arith.constant 0 : index
    %8 = vector.load %arg7[%c7, %c0_9] : memref<8x128xf32, #tpu.memory_space<vmem>>, vector<1x32xf32>
    %c0_10 = arith.constant 0 : index
    %c0_11 = arith.constant 0 : index
    %9 = vector.load %arg2[%c0_10, %c0_11] : memref<32x64xf32, #tpu.memory_space<vmem>>, vector<32x64xf32>
    %cst = arith.constant dense<0.000000e+00> : vector<128x64xf32>
    %10 = tpu.matmul %0, %9, %cst {dimension_numbers = #tpu.dot_dimension_numbers<[1], [0], [0], [1], [0, 0, 1, 1], [], []>} : vector<128x32xf32>, vector<32x64xf32>, vector<128x64xf32> -> vector<128x64xf32>
    %11 = vector.extract_strided_slice %10 {offsets = [0, 0], sizes = [128, 32], strides = [1, 1]} : vector<128x64xf32> to vector<128x32xf32>
    %12 = vector.broadcast %1 : vector<1x32xf32> to vector<128x32xf32>
    %13 = arith.addf %11, %12 : vector<128x32xf32>
    %cst_12 = arith.constant 0.000000e+00 : f32
    %14 = vector.broadcast %cst_12 : f32 to vector<128x32xf32>
    %15 = arith.maximumf %13, %14 : vector<128x32xf32>
    %16 = vector.extract_strided_slice %10 {offsets = [0, 32], sizes = [128, 32], strides = [1, 1]} : vector<128x64xf32> to vector<128x32xf32>
    %c0_13 = arith.constant 0 : index
    %c0_14 = arith.constant 0 : index
    %17 = vector.load %arg3[%c0_13, %c0_14] : memref<32x32xf32, #tpu.memory_space<vmem>>, vector<32x32xf32>
    %cst_15 = arith.constant dense<0.000000e+00> : vector<128x32xf32>
    %18 = tpu.matmul %15, %17, %cst_15 {dimension_numbers = #tpu.dot_dimension_numbers<[1], [0], [0], [1], [0, 0, 1, 1], [], []>} : vector<128x32xf32>, vector<32x32xf32>, vector<128x32xf32> -> vector<128x32xf32>
    %19 = vector.broadcast %2 : vector<1x32xf32> to vector<128x32xf32>
    %20 = arith.addf %18, %19 : vector<128x32xf32>
    %cst_16 = arith.constant 0.000000e+00 : f32
    %21 = vector.broadcast %cst_16 : f32 to vector<128x32xf32>
    %22 = arith.maximumf %20, %21 : vector<128x32xf32>
    %23 = arith.addf %22, %16 : vector<128x32xf32>
    %c0_17 = arith.constant 0 : index
    %c0_18 = arith.constant 0 : index
    %24 = vector.load %arg4[%c0_17, %c0_18] : memref<32x32xf32, #tpu.memory_space<vmem>>, vector<32x32xf32>
    %cst_19 = arith.constant dense<0.000000e+00> : vector<128x32xf32>
    %25 = tpu.matmul %23, %24, %cst_19 {dimension_numbers = #tpu.dot_dimension_numbers<[1], [0], [0], [1], [0, 0, 1, 1], [], []>} : vector<128x32xf32>, vector<32x32xf32>, vector<128x32xf32> -> vector<128x32xf32>
    %26 = vector.broadcast %3 : vector<1x32xf32> to vector<128x32xf32>
    %27 = arith.addf %25, %26 : vector<128x32xf32>
    %28 = vector.extract_strided_slice %27 {offsets = [0, 0], sizes = [128, 16], strides = [1, 1]} : vector<128x32xf32> to vector<128x16xf32>
    %c0_20 = arith.constant 0 : index
    %c0_21 = arith.constant 0 : index
    %c0_22 = arith.constant 0 : index
    %29 = vector.load %arg5[%c0_20, %c0_21, %c0_22] : memref<4x16x16xf32, #tpu.memory_space<vmem>>, vector<1x16x16xf32>
    %30 = vector.shape_cast %29 : vector<1x16x16xf32> to vector<16x16xf32>
    %cst_23 = arith.constant dense<0.000000e+00> : vector<128x16xf32>
    %31 = tpu.matmul %28, %30, %cst_23 {dimension_numbers = #tpu.dot_dimension_numbers<[1], [0], [0], [1], [0, 0, 1, 1], [], []>} : vector<128x16xf32>, vector<16x16xf32>, vector<128x16xf32> -> vector<128x16xf32>
    %32 = vector.broadcast %4 : vector<1x16xf32> to vector<128x16xf32>
    %33 = arith.addf %31, %32 : vector<128x16xf32>
    %34 = math.tanh %33 : vector<128x16xf32>
    %c1_24 = arith.constant 1 : index
    %c0_25 = arith.constant 0 : index
    %c0_26 = arith.constant 0 : index
    %35 = vector.load %arg5[%c1_24, %c0_25, %c0_26] : memref<4x16x16xf32, #tpu.memory_space<vmem>>, vector<1x16x16xf32>
    %36 = vector.shape_cast %35 : vector<1x16x16xf32> to vector<16x16xf32>
    %cst_27 = arith.constant dense<0.000000e+00> : vector<128x16xf32>
    %37 = tpu.matmul %34, %36, %cst_27 {dimension_numbers = #tpu.dot_dimension_numbers<[1], [0], [0], [1], [0, 0, 1, 1], [], []>} : vector<128x16xf32>, vector<16x16xf32>, vector<128x16xf32> -> vector<128x16xf32>
    %38 = vector.broadcast %5 : vector<1x16xf32> to vector<128x16xf32>
    %39 = arith.addf %37, %38 : vector<128x16xf32>
    %40 = math.tanh %39 : vector<128x16xf32>
    %c2_28 = arith.constant 2 : index
    %c0_29 = arith.constant 0 : index
    %c0_30 = arith.constant 0 : index
    %41 = vector.load %arg5[%c2_28, %c0_29, %c0_30] : memref<4x16x16xf32, #tpu.memory_space<vmem>>, vector<1x16x16xf32>
    %42 = vector.shape_cast %41 : vector<1x16x16xf32> to vector<16x16xf32>
    %cst_31 = arith.constant dense<0.000000e+00> : vector<128x16xf32>
    %43 = tpu.matmul %40, %42, %cst_31 {dimension_numbers = #tpu.dot_dimension_numbers<[1], [0], [0], [1], [0, 0, 1, 1], [], []>} : vector<128x16xf32>, vector<16x16xf32>, vector<128x16xf32> -> vector<128x16xf32>
    %44 = vector.broadcast %6 : vector<1x16xf32> to vector<128x16xf32>
    %45 = arith.addf %43, %44 : vector<128x16xf32>
    %46 = math.tanh %45 : vector<128x16xf32>
    %c3_32 = arith.constant 3 : index
    %c0_33 = arith.constant 0 : index
    %c0_34 = arith.constant 0 : index
    %47 = vector.load %arg5[%c3_32, %c0_33, %c0_34] : memref<4x16x16xf32, #tpu.memory_space<vmem>>, vector<1x16x16xf32>
    %48 = vector.shape_cast %47 : vector<1x16x16xf32> to vector<16x16xf32>
    %cst_35 = arith.constant dense<0.000000e+00> : vector<128x16xf32>
    %49 = tpu.matmul %46, %48, %cst_35 {dimension_numbers = #tpu.dot_dimension_numbers<[1], [0], [0], [1], [0, 0, 1, 1], [], []>} : vector<128x16xf32>, vector<16x16xf32>, vector<128x16xf32> -> vector<128x16xf32>
    %50 = vector.broadcast %7 : vector<1x16xf32> to vector<128x16xf32>
    %51 = arith.addf %49, %50 : vector<128x16xf32>
    %52 = math.tanh %51 : vector<128x16xf32>
    %53 = arith.addf %52, %28 : vector<128x16xf32>
    %c0_36 = arith.constant 0 : index
    %c0_37 = arith.constant 0 : index
    %54 = vector.load %arg6[%c0_36, %c0_37] : memref<16x32xf32, #tpu.memory_space<vmem>>, vector<16x32xf32>
    %cst_38 = arith.constant dense<0.000000e+00> : vector<128x32xf32>
    %55 = tpu.matmul %53, %54, %cst_38 {dimension_numbers = #tpu.dot_dimension_numbers<[1], [0], [0], [1], [0, 0, 1, 1], [], []>} : vector<128x16xf32>, vector<16x32xf32>, vector<128x32xf32> -> vector<128x32xf32>
    %56 = vector.broadcast %8 : vector<1x32xf32> to vector<128x32xf32>
    %57 = arith.addf %55, %56 : vector<128x32xf32>
    %cst_39 = arith.constant dense<0xFF800000> : vector<128xf32>
    %58 = vector.multi_reduction <maximumf>, %57, %cst_39 [1] : vector<128x32xf32> to vector<128xf32>
    %59 = vector.shape_cast %58 : vector<128xf32> to vector<128x1xf32>
    %60 = vector.broadcast %59 : vector<128x1xf32> to vector<128x32xf32>
    %61 = arith.subf %57, %60 : vector<128x32xf32>
    %62 = math.exp %61 : vector<128x32xf32>
    %cst_40 = arith.constant dense<0.000000e+00> : vector<128xf32>
    %63 = vector.multi_reduction <add>, %62, %cst_40 [1] : vector<128x32xf32> to vector<128xf32>
    %64 = vector.shape_cast %63 : vector<128xf32> to vector<128x1xf32>
    %65 = vector.broadcast %64 : vector<128x1xf32> to vector<128x32xf32>
    %66 = arith.divf %62, %65 : vector<128x32xf32>
    %cst_41 = arith.constant 0.000000e+00 : f32
    %67 = vector.broadcast %cst_41 : f32 to vector<128x48xf32>
    %68 = tpu.concatenate %27, %53, %66, %67 in 1 : vector<128x32xf32>, vector<128x16xf32>, vector<128x32xf32>, vector<128x48xf32> -> vector<128x128xf32>
    %c0_42 = arith.constant 0 : index
    %c0_43 = arith.constant 0 : index
    %69 = vector.load %arg8[%c0_42, %c0_43] : memref<128x128xf32, #tpu.memory_space<vmem>>, vector<128x128xf32>
    tpu.vector_store %arg8[%c0_42, %c0_43], %68 {strides = array<i32>} : memref<128x128xf32, #tpu.memory_space<vmem>>, vector<128x128xf32>,
    return
  }
  func.func @transform_0(%arg0: i32) -> (i32, i32) {
    %c0_i32 = arith.constant 0 : i32
    %c0_i32_0 = arith.constant 0 : i32
    return %arg0, %c0_i32 : i32, i32
  }
  func.func @transform_1(%arg0: i32) -> (i32, i32) {
    %c0_i32 = arith.constant 0 : i32
    %c0_i32_0 = arith.constant 0 : i32
    %c0_i32_1 = arith.constant 0 : i32
    return %c0_i32, %c0_i32_0 : i32, i32
  }
  func.func @transform_2(%arg0: i32) -> (i32, i32) {
    %c0_i32 = arith.constant 0 : i32
    %c0_i32_0 = arith.constant 0 : i32
    %c0_i32_1 = arith.constant 0 : i32
    return %c0_i32, %c0_i32_0 : i32, i32
  }
  func.func @transform_3(%arg0: i32) -> (i32, i32) {
    %c0_i32 = arith.constant 0 : i32
    %c0_i32_0 = arith.constant 0 : i32
    %c0_i32_1 = arith.constant 0 : i32
    return %c0_i32, %c0_i32_0 : i32, i32
  }
  func.func @transform_4(%arg0: i32) -> (i32, i32, i32) {
    %c0_i32 = arith.constant 0 : i32
    %c0_i32_0 = arith.constant 0 : i32
    %c0_i32_1 = arith.constant 0 : i32
    %c0_i32_2 = arith.constant 0 : i32
    return %c0_i32, %c0_i32_0, %c0_i32_1 : i32, i32, i32
  }
  func.func @transform_5(%arg0: i32) -> (i32, i32) {
    %c0_i32 = arith.constant 0 : i32
    %c0_i32_0 = arith.constant 0 : i32
    %c0_i32_1 = arith.constant 0 : i32
    return %c0_i32, %c0_i32_0 : i32, i32
  }
  func.func @transform_6(%arg0: i32) -> (i32, i32) {
    %c0_i32 = arith.constant 0 : i32
    %c0_i32_0 = arith.constant 0 : i32
    %c0_i32_1 = arith.constant 0 : i32
    return %c0_i32, %c0_i32_0 : i32, i32
  }
  func.func @transform_7(%arg0: i32) -> (i32, i32) {
    %c0_i32 = arith.constant 0 : i32
    %c0_i32_0 = arith.constant 0 : i32
    return %arg0, %c0_i32 : i32, i32
  }
}

</mosaic_0001>

<bundles_post_ra>
// kernel: ntm_forward.1
= control target key start
LH: loop header
LB: loop body
LE: loop exit
PB: predicated region body
PF: predicated region fallthrough
CT: control target
= control target key end

     0   :  { %s3364_s24 = smov 0   ;;  %s4165_s0 = inlined_call_operand.vmem [shape: f32[256,32], index: 0, kind: input, shape index: {}]   ;;  %s4166_s1 = inlined_call_operand.vmem [shape: f32[32,64], index: 1, kind: input, shape index: {}]   ;;  %s4167_s2 = inlined_call_operand.vmem [shape: f32[32,32], index: 2, kind: input, shape index: {}]   ;;  %s4168_s3 = inlined_call_operand.vmem [shape: f32[32,32], index: 3, kind: input, shape index: {}]   ;;  %s4169_s4 = inlined_call_operand.vmem [shape: f32[4,16,16], index: 4, kind: input, shape index: {}]   ;;  %s4170_s5 = inlined_call_operand.vmem [shape: f32[16,32], index: 5, kind: input, shape index: {}]   ;;  %s4171_s6 = inlined_call_operand.vmem [shape: f32[8,128], index: 6, kind: input, shape index: {}]   ;;  %s4172_s7 = inlined_call_operand.vmem [shape: f32[256,128], index: 7, kind: output, shape index: {}]  }
   0x1 LB: > { %s2527_s25 = sadd.s32 4294967295, %s3319_s24   ;;  %p2531_p0 = scmp.ge.s32.totalorder %s3319_s24, 1  ;;  %s3319_s24 = sphi %s3364_s24, %s17_s24  }
   0x2   : > { %p238_p1 = scmp.lt.s32.totalorder %s3319_s24, 3 }
   0x4   : > { %p239_p2 = pnand %p2531_p0, %p238_p1 }
   0x5   : > { %v306_v0 = vld [vmem:[%s4166_s1] sm:$0xff] (!%p239_p2)  ;;  %v307_v1 = vld [vmem:[%s4166_s1 + $0x8] sm:$0xff] (!%p239_p2)  ;;  %v308_v2 = vld [vmem:[%s4166_s1 + $0x10] sm:$0xff] (!%p239_p2)  ;;  %s2532_s9 = sshll.u32 (!%p239_p2), %s2527_s25, 4  ;;  %vm310_vm0 = vcmask (!%p239_p2), 261120   ;;  %s3321_s27 = smov (!%p239_p2), 96  }
   0x6   : > { %242 = sbr.rel (%p239_p2) target bundleno = 2314 (0x90a), region = 48  ;;  %v3066_v3 = vpack.c.bf16 (!%p239_p2), %v307_v1, %v306_v0  ;;  %v309_v4 = vld [vmem:[%s4166_s1 + $0x18] sm:$0xff] (!%p239_p2)  ;;  %p271_p3 = scmp.lt.s32.totalorder (!%p239_p2), %s2532_s9, 31  ;;  %v540_v5 = vld [vmem:[%s4167_s2] sm:$0xff] (!%p239_p2)  ;;  %v541_v6 = vld [vmem:[%s4167_s2 + $0x8] sm:$0xff] (!%p239_p2)  ;;  %vm1044_vm1 = vcmask (!%p239_p2), 130048  }
   0x7   : > { %v3070_v7 = vpack.c.bf16 (!%p239_p2), %v309_v4, %v308_v2  ;;  %v3074_v8 = vpack.c.bf16 (!%p239_p2), %v541_v6, %v540_v5  ;;  %v542_v25 = vld [vmem:[%s4167_s2 + $0x10] sm:$0xff] (!%p239_p2)  ;;  %v543_v26 = vld [vmem:[%s4167_s2 + $0x18] sm:$0xff] (!%p239_p2)  ;;  %v3441_v28 = vld [vmem:[%s4171_s6] ss:$0 sm:$0xff] (!%p239_p2)  ;;  %s3322_s30 = smov (!%p239_p2), 32   ;;  %s3323_s8 = smov (!%p239_p2), 48  }
   0x8   : > { %3067 = vmatprep.subr.bf16.mxu0 (!%p239_p2), %v3066_v3  ;;  %v3078_v27 = vpack.c.bf16 (!%p239_p2), %v543_v26, %v542_v25  ;;  %v837_v56 = vld [vmem:[%s4168_s3] sm:$0xff] (!%p239_p2)  ;;  %v838_v57 = vld [vmem:[%s4168_s3 + $0x8] sm:$0xff] (!%p239_p2)  ;;  %v839_v1 = vld [vmem:[%s4168_s3 + $0x10] sm:$0xff] (!%p239_p2)  ;;  %vm2421_vm2 = vcmask (!%p239_p2), 392192   ;;  %vm2438_vm3 = vcmask (!%p239_p2), 654336  }
   0x9   : > { %3069 = vmatpush3.bf16.msra.mxu0 (!%p239_p2), %v3066_v3  ;;  %3075 = vmatprep.subr.bf16.mxu1 (!%p239_p2), %v3074_v8  ;;  %v3082_v59 = vpack.c.bf16 (!%p239_p2), %v838_v57, %v837_v56  ;;  %v840_v2 = vld [vmem:[%s4168_s3 + $0x18] sm:$0xff] (!%p239_p2) }
   0xa   : > { %3071 = vmatprep.subr.bf16.mxu0 (!%p239_p2), %v3070_v7  ;;  %3077 = vmatpush3.bf16.msra.mxu1 (!%p239_p2), %v3074_v8  ;;  %v3086_v4 = vpack.c.bf16 (!%p239_p2), %v840_v2, %v839_v1 }
   0xb   : > { %3079 = vmatprep.subr.bf16.mxu1 (!%p239_p2), %v3078_v27 }
   0xd   : > { %s4174_s9 = smov (!%p271_p3, %s2532_s9), 31  ;;  %3073 = vmatpush3.bf16.msra.mxu0 %v3070_v7 }
   0xe   : > { %s2533_s16 = sshll.u32 %s4174_s9, 3  ;;  %3081 = vmatpush3.bf16.msra.mxu1 %v3078_v27  ;;  %3083 = vmatprep.subr.bf16.mxu0 %v3082_v59 }
   0xf   : > { %s3398_s19 = scalar_lea.vmem %s4165_s0, %s2533_s16  ;;  %s4075_s12 = scalar_lea.vmem %s4172_s7, %s2533_s16 }
  0x10   : > { %v282_v9 = vld [vmem:[%s3398_s19] sm:$0xff]  ;;  %v283_v10 = vld [vmem:[%s3398_s19 + $0x8] sm:$0xff]  ;;  %v284_v11 = vld [vmem:[%s3398_s19 + $0x10] sm:$0xff] }
  0x11   : > { %2838 = vmatprep.mubr.msk.f32.mxu0 %vm310_vm0, %v282_v9  ;;  %v285_v12 = vld [vmem:[%s3398_s19 + $0x18] sm:$0xff]  ;;  %v286_v13 = vld [vmem:[%s3398_s19 + $0x20] sm:$0xff]  ;;  %v287_v14 = vld [vmem:[%s3398_s19 + $0x28] sm:$0xff] }
  0x12   : > { %2839 = vmatmul.mubr.msk.f32.vlgmr.msra.gmra.mrb[0].mxu0 %vm310_vm0, %v283_v10  ;;  %v288_v15 = vld [vmem:[%s3398_s19 + $0x30] sm:$0xff]  ;;  %v289_v16 = vld [vmem:[%s3398_s19 + $0x38] sm:$0xff]  ;;  %v290_v17 = vld [vmem:[%s3398_s19 + $0x40] sm:$0xff] }
  0x13   : > { %2841 = vmatprep.mubr.msk.f32.mxu0 %vm310_vm0, %v284_v11  ;;  %v291_v18 = vld [vmem:[%s3398_s19 + $0x48] sm:$0xff]  ;;  %v292_v19 = vld [vmem:[%s3398_s19 + $0x50] sm:$0xff]  ;;  %v293_v20 = vld [vmem:[%s3398_s19 + $0x58] sm:$0xff]  ;;  %3085 = vmatpush3.bf16.msra.mxu0 %v3082_v59 }
  0x14   : > { %v294_v21 = vld [vmem:[%s3398_s19 + $0x60] sm:$0xff]  ;;  %v295_v22 = vld [vmem:[%s3398_s19 + $0x68] sm:$0xff]  ;;  %v296_v23 = vld [vmem:[%s3398_s19 + $0x70] sm:$0xff]  ;;  %3087 = vmatprep.subr.bf16.mxu0 %v3086_v4 }
  0x15   : > { %v297_v24 = vld [vmem:[%s3398_s19 + $0x78] sm:$0xff] }
  0x16   : > { %2842 = vmatmul.mubr.msk.f32.gmra.mrb[2].mxu0 %vm310_vm0, %v285_v12 }
  0x17   : > { %2844 = vmatprep.mubr.msk.f32.mxu0 %vm310_vm0, %v286_v13  ;;  %3089 = vmatpush3.bf16.msra.mxu0 %v3086_v4 }
  0x1a   : > { %2845 = vmatmul.mubr.msk.f32.gmra.mrb[4].mxu0 %vm310_vm0, %v287_v14 }
  0x1b   : > { %2847 = vmatprep.mubr.msk.f32.mxu0 %vm310_vm0, %v288_v15 }
  0x1e   : > { %2848 = vmatmul.mubr.msk.f32.gmra.mrb[6].mxu0 %vm310_vm0, %v289_v16 }
  0x1f   : > { %2850 = vmatprep.mubr.msk.f32.mxu0 %vm310_vm0, %v290_v17 }
  0x22   : > { %2851 = vmatmul.mubr.msk.f32.gmra.mrb[8].mxu0 %vm310_vm0, %v291_v18 }
  0x23   : > { %2853 = vmatprep.mubr.msk.f32.mxu0 %vm310_vm0, %v292_v19  ;;  %v1038_v19 = vld [vmem:[%s4169_s4] sm:$0xff] }
  0x26   : > { %2854 = vmatmul.mubr.msk.f32.gmra.mrb[10].mxu0 %vm310_vm0, %v293_v20  ;;  %v1039_v20 = vld [vmem:[%s4169_s4 + $0x8] sm:$0xff] }
  0x27   : > { %2856 = vmatprep.mubr.msk.f32.mxu0 %vm310_vm0, %v294_v21  ;;  %v3090_v21 = vpack.c.bf16 %v1039_v20, %v1038_v19 }
  0x29   : > { %3091 = vmatprep.subr.bf16.mxu1 %v3090_v21 }
  0x2a   : > { %2857 = vmatmul.mubr.msk.f32.gmra.mrb[12].mxu0 %vm310_vm0, %v295_v22 }
  0x2b   : > { %2859 = vmatprep.mubr.msk.f32.mxu0 %vm310_vm0, %v296_v23 }
  0x2e   : > { %2860 = vmatmul.mubr.msk.f32.gmra.mrb[14].mxu0 %vm310_vm0, %v297_v24  ;;  %v3512_v24 = vld [vmem:[%s4171_s6 + $0x1] ss:$0 sm:$0xff] }
  0xe5   : > { %v2840_v29 = vpop.f32.mrb[0].mxu0 }
  0xe6   : > { %v509_v30 = vadd.f32 %v2840_v29, %v3441_v28  ;;  %v425_v31 = vpop.f32.mrb[1].mxu0 }
  0xe7   : > { %v508_v32 = vadd.f32 %v3441_v28, %v425_v31  ;;  %773 = vrot.lane.b32.xlu0 %v425_v31, %s3321_s27 }
  0xe8   : > { %v525_v35 = vmax.f32 %v509_v30, 0.0 }
  0xe9   : > { %v2843_v33 = vpop.f32.mrb[2].mxu0  ;;  %v524_v34 = vmax.f32 %v508_v32, 0.0 }
  0xea   : > { %v511_v36 = vadd.f32 %v2843_v33, %v3441_v28  ;;  %v435_v37 = vpop.f32.mrb[3].mxu0 }
  0xeb   : > { %v510_v38 = vadd.f32 %v3441_v28, %v435_v37  ;;  %775 = vrot.lane.b32.xlu0 %v2840_v29, %s3321_s27  ;;  %2870 = vmatprep.mubr.msk.f32.mxu1 %vm310_vm0, %v524_v34 }
  0xec   : > { %v527_v39 = vmax.f32 %v511_v36, 0.0  ;;  %777 = vrot.lane.b32.xlu1 %v435_v37, %s3321_s27  ;;  %2871 = vmatmul.mubr.msk.f32.vlgmr.msra.gmra.mrb[0].mxu1 %vm310_vm0, %v525_v35 }
  0xed   : > { %v526_v40 = vmax.f32 %v510_v38, 0.0  ;;  %v2846_v41 = vpop.f32.mrb[4].mxu0  ;;  %3093 = vmatpush3.bf16.msra.mxu1 %v3090_v21 }
  0xee   : > { %v513_v42 = vadd.f32 %v2846_v41, %v3441_v28  ;;  %v445_v43 = vpop.f32.mrb[5].mxu0 }
  0xef   : > { %v512_v44 = vadd.f32 %v3441_v28, %v445_v43  ;;  %2873 = vmatprep.mubr.msk.f32.mxu1 %vm310_vm0, %v526_v40  ;;  %781 = vrot.lane.b32.xlu0 %v445_v43, %s3321_s27 }
  0xf0   : > { %v529_v45 = vmax.f32 %v513_v42, 0.0  ;;  %779 = vrot.lane.b32.xlu1 %v2843_v33, %s3321_s27  ;;  %2874 = vmatmul.mubr.msk.f32.gmra.mrb[2].mxu1 %vm310_vm0, %v527_v39 }
  0xf1   : > { %v528_v46 = vmax.f32 %v512_v44, 0.0  ;;  %v2849_v47 = vpop.f32.mrb[6].mxu0 }
  0xf2   : > { %v515_v48 = vadd.f32 %v2849_v47, %v3441_v28  ;;  %v455_v49 = vpop.f32.mrb[7].mxu0 }
  0xf3   : > { %v514_v50 = vadd.f32 %v3441_v28, %v455_v49  ;;  %2876 = vmatprep.mubr.msk.f32.mxu1 %vm310_vm0, %v528_v46  ;;  %785 = vrot.lane.b32.xlu0 %v455_v49, %s3321_s27 }
  0xf4   : > { %v531_v51 = vmax.f32 %v515_v48, 0.0  ;;  %783 = vrot.lane.b32.xlu1 %v2846_v41, %s3321_s27  ;;  %2877 = vmatmul.mubr.msk.f32.gmra.mrb[4].mxu1 %vm310_vm0, %v529_v45 }
  0xf5   : > { %v530_v52 = vmax.f32 %v514_v50, 0.0  ;;  %v2852_v53 = vpop.f32.mrb[8].mxu0 }
  0xf6   : > { %v517_v54 = vadd.f32 %v2852_v53, %v3441_v28  ;;  %v465_v55 = vpop.f32.mrb[9].mxu0 }
  0xf7   : > { %v516_v58 = vadd.f32 %v3441_v28, %v465_v55  ;;  %2879 = vmatprep.mubr.msk.f32.mxu1 %vm310_vm0, %v530_v52  ;;  %789 = vrot.lane.b32.xlu0 %v465_v55, %s3321_s27 }
  0xf8   : > { %v533_v60 = vmax.f32 %v517_v54, 0.0  ;;  %787 = vrot.lane.b32.xlu1 %v2849_v47, %s3321_s27  ;;  %2880 = vmatmul.mubr.msk.f32.gmra.mrb[6].mxu1 %vm310_vm0, %v531_v51 }
  0xf9   : > { %v532_v61 = vmax.f32 %v516_v58, 0.0  ;;  %v2855_v62 = vpop.f32.mrb[10].mxu0 }
  0xfa   : > { %v519_v63 = vadd.f32 %v2855_v62, %v3441_v28  ;;  %v475_v0 = vpop.f32.mrb[11].mxu0 }
  0xfb   : > { %v518_v3 = vadd.f32 %v3441_v28, %v475_v0  ;;  %2882 = vmatprep.mubr.msk.f32.mxu1 %vm310_vm0, %v532_v61  ;;  %793 = vrot.lane.b32.xlu0 %v475_v0, %s3321_s27 }
  0xfc   : > { %v535_v5 = vmax.f32 %v519_v63, 0.0  ;;  %791 = vrot.lane.b32.xlu1 %v2852_v53, %s3321_s27  ;;  %2883 = vmatmul.mubr.msk.f32.gmra.mrb[8].mxu1 %vm310_vm0, %v533_v60 }
  0xfd   : > { %v534_v6 = vmax.f32 %v518_v3, 0.0  ;;  %v2858_v7 = vpop.f32.mrb[12].mxu0 }
  0xfe   : > { %v521_v8 = vadd.f32 %v2858_v7, %v3441_v28  ;;  %v485_v9 = vpop.f32.mrb[13].mxu0 }
  0xff   : > { %v520_v10 = vadd.f32 %v3441_v28, %v485_v9  ;;  %2885 = vmatprep.mubr.msk.f32.mxu1 %vm310_vm0, %v534_v6  ;;  %797 = vrot.lane.b32.xlu0 %v485_v9, %s3321_s27 }
 0x100   : > { %v537_v11 = vmax.f32 %v521_v8, 0.0  ;;  %795 = vrot.lane.b32.xlu1 %v2855_v62, %s3321_s27  ;;  %2886 = vmatmul.mubr.msk.f32.gmra.mrb[10].mxu1 %vm310_vm0, %v535_v5 }
 0x101   : > { %v536_v12 = vmax.f32 %v520_v10, 0.0  ;;  %v2861_v13 = vpop.f32.mrb[14].mxu0 }
 0x102   : > { %v523_v14 = vadd.f32 %v2861_v13, %v3441_v28  ;;  %v495_v15 = vpop.f32.mrb[15].mxu0 }
 0x103   : > { %v522_v16 = vadd.f32 %v3441_v28, %v495_v15  ;;  %2888 = vmatprep.mubr.msk.f32.mxu1 %vm310_vm0, %v536_v12  ;;  %801 = vrot.lane.b32.xlu0 %v495_v15, %s3321_s27 }
 0x104   : > { %v539_v17 = vmax.f32 %v523_v14, 0.0  ;;  %799 = vrot.lane.b32.xlu1 %v2858_v7, %s3321_s27  ;;  %2889 = vmatmul.mubr.msk.f32.gmra.mrb[12].mxu1 %vm310_vm0, %v537_v11 }
 0x105   : > { %v538_v18 = vmax.f32 %v522_v16, 0.0 }
 0x107   : > { %2891 = vmatprep.mubr.msk.f32.mxu1 %vm310_vm0, %v538_v18 }
 0x108   : > { %2892 = vmatmul.mubr.msk.f32.gmra.mrb[14].mxu1 %vm310_vm0, %v539_v17  ;;  %803 = vrot.lane.b32.xlu1 %v2861_v13, %s3321_s27 }
 0x159   : > { %v774_v23 = vpop.permute.xlu0 %773 }
 0x15d   : > { %v776_v27 = vpop.permute.xlu0 %775 }
 0x15e   : > { %v778_v22 = vpop.permute.xlu1 %777 }
 0x161   : > { %v782_v34 = vpop.permute.xlu0 %781 }
 0x162   : > { %v780_v25 = vpop.permute.xlu1 %779 }
 0x165   : > { %v786_v48 = vpop.permute.xlu0 %785 }
 0x166   : > { %v784_v37 = vpop.permute.xlu1 %783 }
 0x169   : > { %v790_v62 = vpop.permute.xlu0 %789 }
 0x16a   : > { %v788_v51 = vpop.permute.xlu1 %787 }
 0x16d   : > { %v794_v12 = vpop.permute.xlu0 %793 }
 0x16e   : > { %v792_v1 = vpop.permute.xlu1 %791 }
 0x172   : > { %v796_v15 = vpop.permute.xlu1 %795 }
 0x1bf   : > { %v2872_v26 = vpop.f32.mrb[0].mxu1 }
 0x1c0   : > { %v668_v28 = vadd.f32 %v2872_v26, %v3512_v24  ;;  %v662_v29 = vpop.f32.mrb[1].mxu1 }
 0x1c1   : > { %v663_v30 = vadd.f32 %v3512_v24, %v662_v29 }
 0x1c2   : > { %v742_v31 = vmax.f32 %v668_v28, 0.0 }
 0x1c3   : > { %v741_v32 = vmax.f32 %v663_v30, 0.0  ;;  %v2875_v33 = vpop.f32.mrb[2].mxu1  ;;  %v800_v30 = vpop.permute.xlu1 %799 }
 0x1c4   : > { %v678_v35 = vadd.f32 %v2875_v33, %v3512_v24  ;;  %v672_v36 = vpop.f32.mrb[3].mxu1  ;;  %v822_v40 = vadd.f32 %v776_v27, %v742_v31  ;;  %v798_v27 = vpop.permute.xlu0 %797 }
 0x1c5   : > { %v821_v38 = vadd.f32 %v774_v23, %v741_v32  ;;  %v673_v39 = vadd.f32 %v3512_v24, %v672_v36 }
 0x1c6   : > { %v744_v41 = vmax.f32 %v678_v35, 0.0 }
 0x1c7   : > { %v743_v42 = vmax.f32 %v673_v39, 0.0  ;;  %v2878_v43 = vpop.f32.mrb[4].mxu1  ;;  %2902 = vmatprep.mubr.msk.f32.mxu0 %vm310_vm0, %v821_v38 }
 0x1c8   : > { %v688_v44 = vadd.f32 %v2878_v43, %v3512_v24  ;;  %v682_v45 = vpop.f32.mrb[5].mxu1  ;;  %2903 = vmatmul.mubr.msk.f32.vlgmr.msra.gmra.mrb[16].mxu0 %vm310_vm0, %v822_v40  ;;  %v824_v49 = vadd.f32 %v780_v25, %v744_v41  ;;  %v802_v36 = vpop.permute.xlu0 %801  ;;  %v2604_v40 = vld [vmem:[%s4169_s4 + $0x10] sm:$0xff] }
 0x1c9   : > { %v823_v46 = vadd.f32 %v778_v22, %v743_v42  ;;  %v683_v47 = vadd.f32 %v3512_v24, %v682_v45  ;;  %v2570_v42 = vld [vmem:[%s4171_s6 + $0x2] ss:$0 sm:$0xff] }
 0x1ca   : > { %v746_v50 = vmax.f32 %v688_v44, 0.0 }
 0x1cb   : > { %v745_v52 = vmax.f32 %v683_v47, 0.0  ;;  %v2881_v53 = vpop.f32.mrb[6].mxu1  ;;  %2905 = vmatprep.mubr.msk.f32.mxu0 %vm310_vm0, %v823_v46 }
 0x1cc   : > { %v698_v54 = vadd.f32 %v2881_v53, %v3512_v24  ;;  %v692_v55 = vpop.f32.mrb[7].mxu1  ;;  %2906 = vmatmul.mubr.msk.f32.gmra.mrb[18].mxu0 %vm310_vm0, %v824_v49  ;;  %v826_v58 = vadd.f32 %v784_v37, %v746_v50  ;;  %v804_v37 = vpop.permute.xlu1 %803 }
 0x1cd   : > { %v825_v56 = vadd.f32 %v782_v34, %v745_v52  ;;  %v693_v57 = vadd.f32 %v3512_v24, %v692_v55 }
 0x1ce   : > { %v748_v59 = vmax.f32 %v698_v54, 0.0 }
 0x1cf   : > { %v747_v60 = vmax.f32 %v693_v57, 0.0  ;;  %v2884_v61 = vpop.f32.mrb[8].mxu1  ;;  %2908 = vmatprep.mubr.msk.f32.mxu0 %vm310_vm0, %v825_v56 }
 0x1d0   : > { %v708_v63 = vadd.f32 %v2884_v61, %v3512_v24  ;;  %v702_v0 = vpop.f32.mrb[9].mxu1  ;;  %2909 = vmatmul.mubr.msk.f32.gmra.mrb[20].mxu0 %vm310_vm0, %v826_v58  ;;  %v828_v4 = vadd.f32 %v788_v51, %v748_v59 }
 0x1d1   : > { %v827_v2 = vadd.f32 %v786_v48, %v747_v60  ;;  %v703_v3 = vadd.f32 %v3512_v24, %v702_v0 }
 0x1d2   : > { %v750_v5 = vmax.f32 %v708_v63, 0.0 }
 0x1d3   : > { %v749_v6 = vmax.f32 %v703_v3, 0.0  ;;  %v2887_v7 = vpop.f32.mrb[10].mxu1  ;;  %2911 = vmatprep.mubr.msk.f32.mxu0 %vm310_vm0, %v827_v2 }
 0x1d4   : > { %v718_v8 = vadd.f32 %v2887_v7, %v3512_v24  ;;  %v712_v9 = vpop.f32.mrb[11].mxu1  ;;  %2912 = vmatmul.mubr.msk.f32.gmra.mrb[22].mxu0 %vm310_vm0, %v828_v4  ;;  %v830_v13 = vadd.f32 %v792_v1, %v750_v5 }
 0x1d5   : > { %v829_v10 = vadd.f32 %v790_v62, %v749_v6  ;;  %v713_v11 = vadd.f32 %v3512_v24, %v712_v9 }
 0x1d6   : > { %v752_v14 = vmax.f32 %v718_v8, 0.0 }
 0x1d7   : > { %v751_v16 = vmax.f32 %v713_v11, 0.0  ;;  %v2890_v17 = vpop.f32.mrb[12].mxu1  ;;  %2914 = vmatprep.mubr.msk.f32.mxu0 %vm310_vm0, %v829_v10  ;;  %v2623_v11 = vld [vmem:[%s4169_s4 + $0x20] sm:$0xff] }
 0x1d8   : > { %v728_v18 = vadd.f32 %v2890_v17, %v3512_v24  ;;  %v722_v19 = vpop.f32.mrb[13].mxu1  ;;  %2915 = vmatmul.mubr.msk.f32.gmra.mrb[24].mxu0 %vm310_vm0, %v830_v13  ;;  %v832_v22 = vadd.f32 %v796_v15, %v752_v14  ;;  %v3628_v14 = vld [vmem:[%s4171_s6 + $0x3] ss:$0 sm:$0xff] }
 0x1d9   : > { %v831_v20 = vadd.f32 %v794_v12, %v751_v16  ;;  %v723_v21 = vadd.f32 %v3512_v24, %v722_v19  ;;  %v2624_v12 = vld [vmem:[%s4169_s4 + $0x28] sm:$0xff] }
 0x1da   : > { %v754_v23 = vmax.f32 %v728_v18, 0.0  ;;  %v3098_v13 = vpack.c.bf16 %v2624_v12, %v2623_v11 }
 0x1db   : > { %v753_v25 = vmax.f32 %v723_v21, 0.0  ;;  %v2893_v26 = vpop.f32.mrb[14].mxu1  ;;  %2917 = vmatprep.mubr.msk.f32.mxu0 %vm310_vm0, %v831_v20 }
 0x1dc   : > { %v738_v28 = vadd.f32 %v2893_v26, %v3512_v24  ;;  %v732_v29 = vpop.f32.mrb[15].mxu1  ;;  %2918 = vmatmul.mubr.msk.f32.gmra.mrb[26].mxu0 %vm310_vm0, %v832_v22  ;;  %v834_v33 = vadd.f32 %v800_v30, %v754_v23  ;;  %3099 = vmatprep.subr.bf16.mxu1 %v3098_v13 }
 0x1dd   : > { %v833_v31 = vadd.f32 %v798_v27, %v753_v25  ;;  %v733_v32 = vadd.f32 %v3512_v24, %v732_v29  ;;  %v2605_v24 = vld [vmem:[%s4169_s4 + $0x18] sm:$0xff] }
 0x1de   : > { %v756_v34 = vmax.f32 %v738_v28, 0.0  ;;  %v3094_v41 = vpack.c.bf16 %v2605_v24, %v2604_v40 }
 0x1df   : > { %v755_v35 = vmax.f32 %v733_v32, 0.0  ;;  %2920 = vmatprep.mubr.msk.f32.mxu0 %vm310_vm0, %v833_v31 }
 0x1e0   : > { %2921 = vmatmul.mubr.msk.f32.gmra.mrb[28].mxu0 %vm310_vm0, %v834_v33  ;;  %v836_v39 = vadd.f32 %v804_v37, %v756_v34  ;;  %3095 = vmatprep.subr.bf16.mxu0 %v3094_v41 }
 0x1e1   : > { %v835_v38 = vadd.f32 %v802_v36, %v755_v35  ;;  %3097 = vmatpush3.bf16.msra.mxu0 %v3094_v41 }
 0x1e3   : > { %2923 = vmatprep.mubr.msk.f32.mxu0 %vm310_vm0, %v835_v38 }
 0x1e4   : > { %2924 = vmatmul.mubr.msk.f32.gmra.mrb[30].mxu0 %vm310_vm0, %v836_v39 }
 0x29b   : > { %v2904_v43 = vpop.f32.mrb[16].mxu0 }
 0x29c   : > { %v959_v44 = vpop.f32.mrb[17].mxu0  ;;  %v3557_v46 = vadd.f32 %v2904_v43, %v2570_v42 }
 0x29d   : > { %v3555_v45 = vadd.f32 %v2570_v42, %v959_v44 }
 0x29f   : > { %v2907_v47 = vpop.f32.mrb[18].mxu0  ;;  %2930 = vmatprep.mubr.msk.f32.mxu1 %vm1044_vm1, %v3555_v45 }
 0x2a0   : > { %v969_v48 = vpop.f32.mrb[19].mxu0  ;;  %2931 = vmatmul.mubr.msk.f32.vlgmr.msra.gmra.mrb[16].mxu1 %vm1044_vm1, %v3557_v46  ;;  %v3565_v50 = vadd.f32 %v2907_v47, %v2570_v42 }
 0x2a1   : > { %v3563_v49 = vadd.f32 %v2570_v42, %v969_v48  ;;  %3101 = vmatpush3.bf16.msra.mxu1 %v3098_v13 }
 0x2a3   : > { %v2910_v51 = vpop.f32.mrb[20].mxu0  ;;  %2933 = vmatprep.mubr.msk.f32.mxu1 %vm1044_vm1, %v3563_v49 }
 0x2a4   : > { %v979_v52 = vpop.f32.mrb[21].mxu0  ;;  %2934 = vmatmul.mubr.msk.f32.gmra.mrb[18].mxu1 %vm1044_vm1, %v3565_v50  ;;  %v3573_v54 = vadd.f32 %v2910_v51, %v2570_v42 }
 0x2a5   : > { %v3571_v53 = vadd.f32 %v2570_v42, %v979_v52 }
 0x2a7   : > { %v2913_v55 = vpop.f32.mrb[22].mxu0  ;;  %2936 = vmatprep.mubr.msk.f32.mxu1 %vm1044_vm1, %v3571_v53 }
 0x2a8   : > { %v989_v56 = vpop.f32.mrb[23].mxu0  ;;  %2937 = vmatmul.mubr.msk.f32.gmra.mrb[20].mxu1 %vm1044_vm1, %v3573_v54  ;;  %v3581_v58 = vadd.f32 %v2913_v55, %v2570_v42 }
 0x2a9   : > { %v3579_v57 = vadd.f32 %v2570_v42, %v989_v56 }
 0x2ab   : > { %v2916_v59 = vpop.f32.mrb[24].mxu0  ;;  %2939 = vmatprep.mubr.msk.f32.mxu1 %vm1044_vm1, %v3579_v57 }
 0x2ac   : > { %v999_v60 = vpop.f32.mrb[25].mxu0  ;;  %2940 = vmatmul.mubr.msk.f32.gmra.mrb[22].mxu1 %vm1044_vm1, %v3581_v58  ;;  %v3589_v62 = vadd.f32 %v2916_v59, %v2570_v42 }
 0x2ad   : > { %v3587_v61 = vadd.f32 %v2570_v42, %v999_v60 }
 0x2af   : > { %v2919_v63 = vpop.f32.mrb[26].mxu0  ;;  %2942 = vmatprep.mubr.msk.f32.mxu1 %vm1044_vm1, %v3587_v61 }
 0x2b0   : > { %v1009_v0 = vpop.f32.mrb[27].mxu0  ;;  %2943 = vmatmul.mubr.msk.f32.gmra.mrb[24].mxu1 %vm1044_vm1, %v3589_v62  ;;  %v3597_v2 = vadd.f32 %v2919_v63, %v2570_v42 }
 0x2b1   : > { %v3595_v1 = vadd.f32 %v2570_v42, %v1009_v0 }
 0x2b3   : > { %v2922_v3 = vpop.f32.mrb[28].mxu0  ;;  %2945 = vmatprep.mubr.msk.f32.mxu1 %vm1044_vm1, %v3595_v1 }
 0x2b4   : > { %v1019_v4 = vpop.f32.mrb[29].mxu0  ;;  %2946 = vmatmul.mubr.msk.f32.gmra.mrb[26].mxu1 %vm1044_vm1, %v3597_v2  ;;  %v3605_v6 = vadd.f32 %v2922_v3, %v2570_v42 }
 0x2b5   : > { %v3603_v5 = vadd.f32 %v2570_v42, %v1019_v4 }
 0x2b7   : > { %v2925_v7 = vpop.f32.mrb[30].mxu0  ;;  %2948 = vmatprep.mubr.msk.f32.mxu1 %vm1044_vm1, %v3603_v5 }
 0x2b8   : > { %v1029_v8 = vpop.f32.mrb[31].mxu0  ;;  %2949 = vmatmul.mubr.msk.f32.gmra.mrb[28].mxu1 %vm1044_vm1, %v3605_v6  ;;  %v3613_v10 = vadd.f32 %v2925_v7, %v2570_v42 }
 0x2b9   : > { %v3611_v9 = vadd.f32 %v2570_v42, %v1029_v8 }
 0x2bb   : > { %2951 = vmatprep.mubr.msk.f32.mxu1 %vm1044_vm1, %v3611_v9 }
 0x2bc   : > { %2952 = vmatmul.mubr.msk.f32.gmra.mrb[30].mxu1 %vm1044_vm1, %v3613_v10 }
 0x373   : > { %v2932_v15 = vpop.f32.mrb[16].mxu1 }
 0x374   : > { %v1165_v16 = vadd.f32 %v2932_v15, %v3628_v14  ;;  %v1159_v17 = vpop.f32.mrb[17].mxu1  ;;  %v2642_v15 = vld [vmem:[%s4169_s4 + $0x30] sm:$0xff] }
 0x375   : > { %v1160_v18 = vadd.f32 %v3628_v14, %v1159_v17 }
 0x377   : > { %3121 = vtanh.f32 %v1160_v18  ;;  %v2935_v19 = vpop.f32.mrb[18].mxu1  ;;  %v3671_v18 = vld [vmem:[%s4171_s6 + $0x4] ss:$0 sm:$0xff] }
 0x378   : > { %3123 = vtanh.f32 %v1165_v16  ;;  %v1175_v20 = vadd.f32 %v2935_v19, %v3628_v14  ;;  %v1169_v21 = vpop.f32.mrb[19].mxu1  ;;  %v2643_v16 = vld [vmem:[%s4169_s4 + $0x38] sm:$0xff] }
 0x379   : > { %v1170_v22 = vadd.f32 %v3628_v14, %v1169_v21  ;;  %v3102_v17 = vpack.c.bf16 %v2643_v16, %v2642_v15 }
 0x37b   : > { %3125 = vtanh.f32 %v1170_v22  ;;  %v2938_v23 = vpop.f32.mrb[20].mxu1  ;;  %3103 = vmatprep.subr.bf16.mxu0 %v3102_v17 }
 0x37c   : > { %3127 = vtanh.f32 %v1175_v20  ;;  %v1185_v25 = vadd.f32 %v2938_v23, %v3628_v14  ;;  %v1179_v26 = vpop.f32.mrb[21].mxu1 }
 0x37d   : > { %v1180_v27 = vadd.f32 %v3628_v14, %v1179_v26 }
 0x37f   : > { %3129 = vtanh.f32 %v1180_v27  ;;  %v2941_v28 = vpop.f32.mrb[22].mxu1 }
 0x380   : > { %3131 = vtanh.f32 %v1185_v25  ;;  %v1195_v29 = vadd.f32 %v2941_v28, %v3628_v14  ;;  %v1189_v30 = vpop.f32.mrb[23].mxu1 }
 0x381   : > { %v3122_v31 = vpop.eup %3121  ;;  %v1190_v32 = vadd.f32 %v3628_v14, %v1189_v30 }
 0x382   : > { %v3124_v33 = vpop.eup %3123  ;;  %2958 = vmatprep.mubr.msk.f32.mxu0 %vm1044_vm1, %v3122_v31 }
 0x383   : > { %3133 = vtanh.f32 %v1190_v32  ;;  %v2944_v34 = vpop.f32.mrb[24].mxu1  ;;  %2959 = vmatmul.mubr.msk.f32.vlgmr.msra.gmra.mrb[32].mxu0 %vm1044_vm1, %v3124_v33 }
 0x384   : > { %3135 = vtanh.f32 %v1195_v29  ;;  %v1205_v35 = vadd.f32 %v2944_v34, %v3628_v14  ;;  %v1199_v36 = vpop.f32.mrb[25].mxu1  ;;  %3105 = vmatpush3.bf16.msra.mxu0 %v3102_v17 }
 0x385   : > { %v3126_v37 = vpop.eup %3125  ;;  %v1200_v38 = vadd.f32 %v3628_v14, %v1199_v36 }
 0x386   : > { %v3128_v39 = vpop.eup %3127  ;;  %2961 = vmatprep.mubr.msk.f32.mxu0 %vm1044_vm1, %v3126_v37 }
 0x387   : > { %3137 = vtanh.f32 %v1200_v38  ;;  %v2947_v40 = vpop.f32.mrb[26].mxu1  ;;  %2962 = vmatmul.mubr.msk.f32.gmra.mrb[34].mxu0 %vm1044_vm1, %v3128_v39 }
 0x388   : > { %3139 = vtanh.f32 %v1205_v35  ;;  %v1215_v24 = vadd.f32 %v2947_v40, %v3628_v14  ;;  %v1209_v41 = vpop.f32.mrb[27].mxu1 }
 0x389   : > { %v3130_v42 = vpop.eup %3129  ;;  %v1210_v43 = vadd.f32 %v3628_v14, %v1209_v41 }
 0x38a   : > { %v3132_v44 = vpop.eup %3131  ;;  %2964 = vmatprep.mubr.msk.f32.mxu0 %vm1044_vm1, %v3130_v42 }
 0x38b   : > { %3141 = vtanh.f32 %v1210_v43  ;;  %v2950_v47 = vpop.f32.mrb[28].mxu1  ;;  %2965 = vmatmul.mubr.msk.f32.gmra.mrb[36].mxu0 %vm1044_vm1, %v3132_v44 }
 0x38c   : > { %3143 = vtanh.f32 %v1215_v24  ;;  %v1225_v48 = vadd.f32 %v2950_v47, %v3628_v14  ;;  %v1219_v51 = vpop.f32.mrb[29].mxu1 }
 0x38d   : > { %v3134_v52 = vpop.eup %3133  ;;  %v1220_v55 = vadd.f32 %v3628_v14, %v1219_v51 }
 0x38e   : > { %v3136_v56 = vpop.eup %3135  ;;  %2967 = vmatprep.mubr.msk.f32.mxu0 %vm1044_vm1, %v3134_v52 }
 0x38f   : > { %3145 = vtanh.f32 %v1220_v55  ;;  %v2953_v59 = vpop.f32.mrb[30].mxu1  ;;  %2968 = vmatmul.mubr.msk.f32.gmra.mrb[38].mxu0 %vm1044_vm1, %v3136_v56 }
 0x390   : > { %3147 = vtanh.f32 %v1225_v48  ;;  %v1235_v60 = vadd.f32 %v2953_v59, %v3628_v14  ;;  %v1229_v63 = vpop.f32.mrb[31].mxu1 }
 0x391   : > { %v3138_v0 = vpop.eup %3137  ;;  %v1230_v3 = vadd.f32 %v3628_v14, %v1229_v63 }
 0x392   : > { %v3140_v4 = vpop.eup %3139  ;;  %2970 = vmatprep.mubr.msk.f32.mxu0 %vm1044_vm1, %v3138_v0 }
 0x393   : > { %3149 = vtanh.f32 %v1230_v3  ;;  %2971 = vmatmul.mubr.msk.f32.gmra.mrb[40].mxu0 %vm1044_vm1, %v3140_v4 }
 0x394   : > { %3151 = vtanh.f32 %v1235_v60 }
 0x395   : > { %v3142_v7 = vpop.eup %3141 }
 0x396   : > { %v3144_v8 = vpop.eup %3143  ;;  %2973 = vmatprep.mubr.msk.f32.mxu0 %vm1044_vm1, %v3142_v7 }
 0x397   : > { %2974 = vmatmul.mubr.msk.f32.gmra.mrb[42].mxu0 %vm1044_vm1, %v3144_v8 }
 0x399   : > { %v3146_v11 = vpop.eup %3145 }
 0x39a   : > { %v3148_v12 = vpop.eup %3147  ;;  %2976 = vmatprep.mubr.msk.f32.mxu0 %vm1044_vm1, %v3146_v11 }
 0x39b   : > { %2977 = vmatmul.mubr.msk.f32.gmra.mrb[44].mxu0 %vm1044_vm1, %v3148_v12 }
 0x39d   : > { %v3150_v13 = vpop.eup %3149 }
 0x39e   : > { %v3152_v14 = vpop.eup %3151  ;;  %2979 = vmatprep.mubr.msk.f32.mxu0 %vm1044_vm1, %v3150_v13 }
 0x39f   : > { %2980 = vmatmul.mubr.msk.f32.gmra.mrb[46].mxu0 %vm1044_vm1, %v3152_v14 }
 0x456   : > { %v2960_v19 = vpop.f32.mrb[32].mxu0 }
 0x457   : > { %v1381_v20 = vadd.f32 %v2960_v19, %v3671_v18  ;;  %v1375_v21 = vpop.f32.mrb[33].mxu0  ;;  %v1918_v19 = vld [vmem:[%s4170_s5] sm:$0xff] }
 0x458   : > { %v1376_v22 = vadd.f32 %v3671_v18, %v1375_v21 }
 0x45a   : > { %3153 = vtanh.f32 %v1376_v22  ;;  %v2963_v23 = vpop.f32.mrb[34].mxu0  ;;  %v3714_v22 = vld [vmem:[%s4171_s6 + $0x5] ss:$0 sm:$0xff] }
 0x45b   : > { %3155 = vtanh.f32 %v1381_v20  ;;  %v1391_v25 = vadd.f32 %v2963_v23, %v3671_v18  ;;  %v1385_v26 = vpop.f32.mrb[35].mxu0  ;;  %v1919_v20 = vld [vmem:[%s4170_s5 + $0x8] sm:$0xff] }
 0x45c   : > { %v1386_v27 = vadd.f32 %v3671_v18, %v1385_v26  ;;  %v3106_v21 = vpack.c.bf16 %v1919_v20, %v1918_v19 }
 0x45e   : > { %3157 = vtanh.f32 %v1386_v27  ;;  %v2966_v28 = vpop.f32.mrb[36].mxu0  ;;  %3107 = vmatprep.subr.bf16.mxu1 %v3106_v21 }
 0x45f   : > { %3159 = vtanh.f32 %v1391_v25  ;;  %v1401_v29 = vadd.f32 %v2966_v28, %v3671_v18  ;;  %v1395_v30 = vpop.f32.mrb[37].mxu0 }
 0x460   : > { %v1396_v31 = vadd.f32 %v3671_v18, %v1395_v30 }
 0x462   : > { %3161 = vtanh.f32 %v1396_v31  ;;  %v2969_v32 = vpop.f32.mrb[38].mxu0 }
 0x463   : > { %3163 = vtanh.f32 %v1401_v29  ;;  %v1411_v33 = vadd.f32 %v2969_v32, %v3671_v18  ;;  %v1405_v34 = vpop.f32.mrb[39].mxu0 }
 0x464   : > { %v3154_v35 = vpop.eup %3153  ;;  %v1406_v36 = vadd.f32 %v3671_v18, %v1405_v34 }
 0x465   : > { %v3156_v37 = vpop.eup %3155  ;;  %2986 = vmatprep.mubr.msk.f32.mxu1 %vm1044_vm1, %v3154_v35 }
 0x466   : > { %3165 = vtanh.f32 %v1406_v36  ;;  %v2972_v38 = vpop.f32.mrb[40].mxu0  ;;  %2987 = vmatmul.mubr.msk.f32.vlgmr.msra.gmra.mrb[32].mxu1 %vm1044_vm1, %v3156_v37 }
 0x467   : > { %3167 = vtanh.f32 %v1411_v33  ;;  %v1421_v39 = vadd.f32 %v2972_v38, %v3671_v18  ;;  %v1415_v40 = vpop.f32.mrb[41].mxu0  ;;  %3109 = vmatpush3.bf16.msra.mxu1 %v3106_v21 }
 0x468   : > { %v3158_v24 = vpop.eup %3157  ;;  %v1416_v41 = vadd.f32 %v3671_v18, %v1415_v40 }
 0x469   : > { %v3160_v42 = vpop.eup %3159  ;;  %2989 = vmatprep.mubr.msk.f32.mxu1 %vm1044_vm1, %v3158_v24 }
 0x46a   : > { %3169 = vtanh.f32 %v1416_v41  ;;  %v2975_v43 = vpop.f32.mrb[42].mxu0  ;;  %2990 = vmatmul.mubr.msk.f32.gmra.mrb[34].mxu1 %vm1044_vm1, %v3160_v42 }
 0x46b   : > { %3171 = vtanh.f32 %v1421_v39  ;;  %v1431_v44 = vadd.f32 %v2975_v43, %v3671_v18  ;;  %v1425_v47 = vpop.f32.mrb[43].mxu0 }
 0x46c   : > { %v3162_v48 = vpop.eup %3161  ;;  %v1426_v51 = vadd.f32 %v3671_v18, %v1425_v47 }
 0x46d   : > { %v3164_v52 = vpop.eup %3163  ;;  %2992 = vmatprep.mubr.msk.f32.mxu1 %vm1044_vm1, %v3162_v48 }
 0x46e   : > { %3173 = vtanh.f32 %v1426_v51  ;;  %v2978_v55 = vpop.f32.mrb[44].mxu0  ;;  %2993 = vmatmul.mubr.msk.f32.gmra.mrb[36].mxu1 %vm1044_vm1, %v3164_v52 }
 0x46f   : > { %3175 = vtanh.f32 %v1431_v44  ;;  %v1441_v56 = vadd.f32 %v2978_v55, %v3671_v18  ;;  %v1435_v59 = vpop.f32.mrb[45].mxu0 }
 0x470   : > { %v3166_v60 = vpop.eup %3165  ;;  %v1436_v63 = vadd.f32 %v3671_v18, %v1435_v59 }
 0x471   : > { %v3168_v0 = vpop.eup %3167  ;;  %2995 = vmatprep.mubr.msk.f32.mxu1 %vm1044_vm1, %v3166_v60 }
 0x472   : > { %3177 = vtanh.f32 %v1436_v63  ;;  %v2981_v3 = vpop.f32.mrb[46].mxu0  ;;  %2996 = vmatmul.mubr.msk.f32.gmra.mrb[38].mxu1 %vm1044_vm1, %v3168_v0 }
 0x473   : > { %3179 = vtanh.f32 %v1441_v56  ;;  %v1451_v4 = vadd.f32 %v2981_v3, %v3671_v18  ;;  %v1445_v7 = vpop.f32.mrb[47].mxu0 }
 0x474   : > { %v3170_v8 = vpop.eup %3169  ;;  %v1446_v11 = vadd.f32 %v3671_v18, %v1445_v7 }
 0x475   : > { %v3172_v12 = vpop.eup %3171  ;;  %2998 = vmatprep.mubr.msk.f32.mxu1 %vm1044_vm1, %v3170_v8 }
 0x476   : > { %3181 = vtanh.f32 %v1446_v11  ;;  %2999 = vmatmul.mubr.msk.f32.gmra.mrb[40].mxu1 %vm1044_vm1, %v3172_v12 }
 0x477   : > { %3183 = vtanh.f32 %v1451_v4 }
 0x478   : > { %v3174_v13 = vpop.eup %3173 }
 0x479   : > { %v3176_v14 = vpop.eup %3175  ;;  %3001 = vmatprep.mubr.msk.f32.mxu1 %vm1044_vm1, %v3174_v13 }
 0x47a   : > { %3002 = vmatmul.mubr.msk.f32.gmra.mrb[42].mxu1 %vm1044_vm1, %v3176_v14 }
 0x47c   : > { %v3178_v15 = vpop.eup %3177 }
 0x47d   : > { %v3180_v16 = vpop.eup %3179  ;;  %3004 = vmatprep.mubr.msk.f32.mxu1 %vm1044_vm1, %v3178_v15 }
 0x47e   : > { %3005 = vmatmul.mubr.msk.f32.gmra.mrb[44].mxu1 %vm1044_vm1, %v3180_v16 }
 0x480   : > { %v3182_v17 = vpop.eup %3181 }
 0x481   : > { %v3184_v18 = vpop.eup %3183  ;;  %3007 = vmatprep.mubr.msk.f32.mxu1 %vm1044_vm1, %v3182_v17 }
 0x482   : > { %3008 = vmatmul.mubr.msk.f32.gmra.mrb[46].mxu1 %vm1044_vm1, %v3184_v18 }
 0x539   : > { %v2988_v23 = vpop.f32.mrb[32].mxu1 }
 0x53a   : > { %v1597_v25 = vadd.f32 %v2988_v23, %v3714_v22  ;;  %v1591_v26 = vpop.f32.mrb[33].mxu1  ;;  %v3751_v23 = vld [vmem:[%s4171_s6 + $0x6] ss:$0 sm:$0xff] }
 0x53b   : > { %v1592_v27 = vadd.f32 %v3714_v22, %v1591_v26 }
 0x53d   : > { %3185 = vtanh.f32 %v1592_v27  ;;  %v2991_v28 = vpop.f32.mrb[34].mxu1 }
 0x53e   : > { %3187 = vtanh.f32 %v1597_v25  ;;  %v1607_v29 = vadd.f32 %v2991_v28, %v3714_v22  ;;  %v1601_v30 = vpop.f32.mrb[35].mxu1 }
 0x53f   : > { %v1602_v31 = vadd.f32 %v3714_v22, %v1601_v30 }
 0x541   : > { %3189 = vtanh.f32 %v1602_v31  ;;  %v2994_v32 = vpop.f32.mrb[36].mxu1 }
 0x542   : > { %3191 = vtanh.f32 %v1607_v29  ;;  %v1617_v33 = vadd.f32 %v2994_v32, %v3714_v22  ;;  %v1611_v34 = vpop.f32.mrb[37].mxu1 }
 0x543   : > { %v1612_v35 = vadd.f32 %v3714_v22, %v1611_v34 }
 0x545   : > { %3193 = vtanh.f32 %v1612_v35  ;;  %v2997_v36 = vpop.f32.mrb[38].mxu1 }
 0x546   : > { %3195 = vtanh.f32 %v1617_v33  ;;  %v1627_v37 = vadd.f32 %v2997_v36, %v3714_v22  ;;  %v1621_v38 = vpop.f32.mrb[39].mxu1 }
 0x547   : > { %v3186_v39 = vpop.eup %3185  ;;  %v1622_v40 = vadd.f32 %v3714_v22, %v1621_v38 }
 0x548   : > { %v3188_v24 = vpop.eup %3187  ;;  %3014 = vmatprep.mubr.msk.f32.mxu0 %vm1044_vm1, %v3186_v39 }
 0x549   : > { %3197 = vtanh.f32 %v1622_v40  ;;  %v3000_v41 = vpop.f32.mrb[40].mxu1  ;;  %3015 = vmatmul.mubr.msk.f32.vlgmr.msra.gmra.mrb[48].mxu0 %vm1044_vm1, %v3188_v24 }
 0x54a   : > { %3199 = vtanh.f32 %v1627_v37  ;;  %v1637_v42 = vadd.f32 %v3000_v41, %v3714_v22  ;;  %v1631_v43 = vpop.f32.mrb[41].mxu1 }
 0x54b   : > { %v3190_v44 = vpop.eup %3189  ;;  %v1632_v47 = vadd.f32 %v3714_v22, %v1631_v43 }
 0x54c   : > { %v3192_v48 = vpop.eup %3191  ;;  %3017 = vmatprep.mubr.msk.f32.mxu0 %vm1044_vm1, %v3190_v44 }
 0x54d   : > { %3201 = vtanh.f32 %v1632_v47  ;;  %v3003_v51 = vpop.f32.mrb[42].mxu1  ;;  %3018 = vmatmul.mubr.msk.f32.gmra.mrb[50].mxu0 %vm1044_vm1, %v3192_v48 }
 0x54e   : > { %3203 = vtanh.f32 %v1637_v42  ;;  %v1647_v52 = vadd.f32 %v3003_v51, %v3714_v22  ;;  %v1641_v55 = vpop.f32.mrb[43].mxu1 }
 0x54f   : > { %v3194_v56 = vpop.eup %3193  ;;  %v1642_v59 = vadd.f32 %v3714_v22, %v1641_v55 }
 0x550   : > { %v3196_v60 = vpop.eup %3195  ;;  %3020 = vmatprep.mubr.msk.f32.mxu0 %vm1044_vm1, %v3194_v56 }
 0x551   : > { %3205 = vtanh.f32 %v1642_v59  ;;  %v3006_v63 = vpop.f32.mrb[44].mxu1  ;;  %3021 = vmatmul.mubr.msk.f32.gmra.mrb[52].mxu0 %vm1044_vm1, %v3196_v60 }
 0x552   : > { %3207 = vtanh.f32 %v1647_v52  ;;  %v1657_v0 = vadd.f32 %v3006_v63, %v3714_v22  ;;  %v1651_v3 = vpop.f32.mrb[45].mxu1 }
 0x553   : > { %v3198_v4 = vpop.eup %3197  ;;  %v1652_v7 = vadd.f32 %v3714_v22, %v1651_v3 }
 0x554   : > { %v3200_v8 = vpop.eup %3199  ;;  %3023 = vmatprep.mubr.msk.f32.mxu0 %vm1044_vm1, %v3198_v4 }
 0x555   : > { %3209 = vtanh.f32 %v1652_v7  ;;  %v3009_v11 = vpop.f32.mrb[46].mxu1  ;;  %3024 = vmatmul.mubr.msk.f32.gmra.mrb[54].mxu0 %vm1044_vm1, %v3200_v8 }
 0x556   : > { %3211 = vtanh.f32 %v1657_v0  ;;  %v1667_v12 = vadd.f32 %v3009_v11, %v3714_v22  ;;  %v1661_v13 = vpop.f32.mrb[47].mxu1 }
 0x557   : > { %v3202_v14 = vpop.eup %3201  ;;  %v1662_v15 = vadd.f32 %v3714_v22, %v1661_v13 }
 0x558   : > { %v3204_v16 = vpop.eup %3203  ;;  %3026 = vmatprep.mubr.msk.f32.mxu0 %vm1044_vm1, %v3202_v14 }
 0x559   : > { %3213 = vtanh.f32 %v1662_v15  ;;  %3027 = vmatmul.mubr.msk.f32.gmra.mrb[56].mxu0 %vm1044_vm1, %v3204_v16 }
 0x55a   : > { %3215 = vtanh.f32 %v1667_v12 }
 0x55b   : > { %v3206_v17 = vpop.eup %3205 }
 0x55c   : > { %v3208_v18 = vpop.eup %3207  ;;  %3029 = vmatprep.mubr.msk.f32.mxu0 %vm1044_vm1, %v3206_v17 }
 0x55d   : > { %3030 = vmatmul.mubr.msk.f32.gmra.mrb[58].mxu0 %vm1044_vm1, %v3208_v18 }
 0x55f   : > { %v3210_v19 = vpop.eup %3209 }
 0x560   : > { %v3212_v20 = vpop.eup %3211  ;;  %3032 = vmatprep.mubr.msk.f32.mxu0 %vm1044_vm1, %v3210_v19 }
 0x561   : > { %3033 = vmatmul.mubr.msk.f32.gmra.mrb[60].mxu0 %vm1044_vm1, %v3212_v20 }
 0x563   : > { %v3214_v21 = vpop.eup %3213 }
 0x564   : > { %v3216_v22 = vpop.eup %3215  ;;  %3035 = vmatprep.mubr.msk.f32.mxu0 %vm1044_vm1, %v3214_v21 }
 0x565   : > { %3036 = vmatmul.mubr.msk.f32.gmra.mrb[62].mxu0 %vm1044_vm1, %v3216_v22 }
 0x61c   : > { %v3016_v25 = vpop.f32.mrb[48].mxu0 }
 0x61d   : > { %v1813_v26 = vadd.f32 %v3016_v25, %v3751_v23  ;;  %v1807_v27 = vpop.f32.mrb[49].mxu0 }
 0x61e   : > { %v1808_v28 = vadd.f32 %v3751_v23, %v1807_v27 }
 0x61f   : > { %3217 = vtanh.f32 %v1813_v26 }
 0x620   : > { %3219 = vtanh.f32 %v1808_v28  ;;  %v3019_v29 = vpop.f32.mrb[50].mxu0 }
 0x621   : > { %v1823_v30 = vadd.f32 %v3019_v29, %v3751_v23  ;;  %v1817_v31 = vpop.f32.mrb[51].mxu0 }
 0x622   : > { %v1818_v32 = vadd.f32 %v3751_v23, %v1817_v31 }
 0x623   : > { %3221 = vtanh.f32 %v1823_v30 }
 0x624   : > { %3223 = vtanh.f32 %v1818_v32  ;;  %v3022_v33 = vpop.f32.mrb[52].mxu0 }
 0x625   : > { %v1833_v34 = vadd.f32 %v3022_v33, %v3751_v23  ;;  %v1827_v35 = vpop.f32.mrb[53].mxu0 }
 0x626   : > { %v1828_v36 = vadd.f32 %v3751_v23, %v1827_v35 }
 0x627   : > { %3225 = vtanh.f32 %v1833_v34 }
 0x628   : > { %3227 = vtanh.f32 %v1828_v36  ;;  %v3025_v37 = vpop.f32.mrb[54].mxu0 }
 0x629   : > { %v3218_v38 = vpop.eup %3217  ;;  %v1843_v39 = vadd.f32 %v3025_v37, %v3751_v23  ;;  %v1837_v40 = vpop.f32.mrb[55].mxu0 }
 0x62a   : > { %v3220_v24 = vpop.eup %3219  ;;  %v1838_v41 = vadd.f32 %v3751_v23, %v1837_v40  ;;  %v3765_v43 = vadd.f32 %v3218_v38, %v3557_v46 }
 0x62b   : > { %3229 = vtanh.f32 %v1843_v39  ;;  %v3762_v42 = vadd.f32 %v3220_v24, %v3555_v45  ;;  %v2661_v24 = vld [vmem:[%s4171_s6 + $0x7] ss:$0 sm:$0xff] }
 0x62c   : > { %3231 = vtanh.f32 %v1838_v41  ;;  %v3028_v44 = vpop.f32.mrb[56].mxu0 }
 0x62d   : > { %v3222_v47 = vpop.eup %3221  ;;  %v1853_v48 = vadd.f32 %v3028_v44, %v3751_v23  ;;  %v1847_v51 = vpop.f32.mrb[57].mxu0  ;;  %3042 = vmatprep.mubr.msk.f32.mxu1 %vm1044_vm1, %v3762_v42 }
 0x62e   : > { %v3224_v52 = vpop.eup %3223  ;;  %v1848_v55 = vadd.f32 %v3751_v23, %v1847_v51  ;;  %3043 = vmatmul.mubr.msk.f32.vlgmr.msra.gmra.mrb[48].mxu1 %vm1044_vm1, %v3765_v43  ;;  %v3777_v60 = vadd.f32 %v3222_v47, %v3565_v50 }
 0x62f   : > { %3233 = vtanh.f32 %v1853_v48  ;;  %v3774_v56 = vadd.f32 %v3224_v52, %v3563_v49 }
 0x630   : > { %3235 = vtanh.f32 %v1848_v55  ;;  %v3031_v59 = vpop.f32.mrb[58].mxu0 }
 0x631   : > { %v3226_v63 = vpop.eup %3225  ;;  %v1863_v0 = vadd.f32 %v3031_v59, %v3751_v23  ;;  %v1857_v3 = vpop.f32.mrb[59].mxu0  ;;  %3045 = vmatprep.mubr.msk.f32.mxu1 %vm1044_vm1, %v3774_v56 }
 0x632   : > { %v3228_v4 = vpop.eup %3227  ;;  %v1858_v7 = vadd.f32 %v3751_v23, %v1857_v3  ;;  %3046 = vmatmul.mubr.msk.f32.gmra.mrb[50].mxu1 %vm1044_vm1, %v3777_v60  ;;  %v3789_v12 = vadd.f32 %v3226_v63, %v3573_v54 }
 0x633   : > { %3237 = vtanh.f32 %v1863_v0  ;;  %v3786_v8 = vadd.f32 %v3228_v4, %v3571_v53 }
 0x634   : > { %3239 = vtanh.f32 %v1858_v7  ;;  %v3034_v11 = vpop.f32.mrb[60].mxu0 }
 0x635   : > { %v3230_v13 = vpop.eup %3229  ;;  %v1873_v14 = vadd.f32 %v3034_v11, %v3751_v23  ;;  %v1867_v15 = vpop.f32.mrb[61].mxu0  ;;  %3048 = vmatprep.mubr.msk.f32.mxu1 %vm1044_vm1, %v3786_v8 }
 0x636   : > { %v3232_v16 = vpop.eup %3231  ;;  %v1868_v17 = vadd.f32 %v3751_v23, %v1867_v15  ;;  %3049 = vmatmul.mubr.msk.f32.gmra.mrb[52].mxu1 %vm1044_vm1, %v3789_v12  ;;  %v3801_v20 = vadd.f32 %v3230_v13, %v3581_v58 }
 0x637   : > { %3241 = vtanh.f32 %v1873_v14  ;;  %v3798_v18 = vadd.f32 %v3232_v16, %v3579_v57 }
 0x638   : > { %3243 = vtanh.f32 %v1868_v17  ;;  %v3037_v19 = vpop.f32.mrb[62].mxu0 }
 0x639   : > { %v3234_v21 = vpop.eup %3233  ;;  %v1883_v22 = vadd.f32 %v3037_v19, %v3751_v23  ;;  %v1877_v25 = vpop.f32.mrb[63].mxu0  ;;  %3051 = vmatprep.mubr.msk.f32.mxu1 %vm1044_vm1, %v3798_v18 }
 0x63a   : > { %v3236_v26 = vpop.eup %3235  ;;  %v1878_v27 = vadd.f32 %v3751_v23, %v1877_v25  ;;  %3052 = vmatmul.mubr.msk.f32.gmra.mrb[54].mxu1 %vm1044_vm1, %v3801_v20  ;;  %v3813_v29 = vadd.f32 %v3234_v21, %v3589_v62 }
 0x63b   : > { %3245 = vtanh.f32 %v1883_v22  ;;  %v3810_v28 = vadd.f32 %v3236_v26, %v3587_v61 }
 0x63c   : > { %3247 = vtanh.f32 %v1878_v27 }
 0x63d   : > { %v3238_v30 = vpop.eup %3237  ;;  %3054 = vmatprep.mubr.msk.f32.mxu1 %vm1044_vm1, %v3810_v28 }
 0x63e   : > { %v3240_v31 = vpop.eup %3239  ;;  %3055 = vmatmul.mubr.msk.f32.gmra.mrb[56].mxu1 %vm1044_vm1, %v3813_v29  ;;  %v3823_v32 = vadd.f32 %v3238_v30, %v3597_v2 }
 0x63f   : > { %v3820_v23 = vadd.f32 %v3240_v31, %v3595_v1 }
 0x641   : > { %v3242_v33 = vpop.eup %3241  ;;  %3057 = vmatprep.mubr.msk.f32.mxu1 %vm1044_vm1, %v3820_v23 }
 0x642   : > { %v3244_v34 = vpop.eup %3243  ;;  %3058 = vmatmul.mubr.msk.f32.gmra.mrb[58].mxu1 %vm1044_vm1, %v3823_v32  ;;  %v3833_v36 = vadd.f32 %v3242_v33, %v3605_v6 }
 0x643   : > { %v3830_v35 = vadd.f32 %v3244_v34, %v3603_v5 }
 0x645   : > { %v3246_v37 = vpop.eup %3245  ;;  %3060 = vmatprep.mubr.msk.f32.mxu1 %vm1044_vm1, %v3830_v35 }
 0x646   : > { %v3248_v38 = vpop.eup %3247  ;;  %3061 = vmatmul.mubr.msk.f32.gmra.mrb[60].mxu1 %vm1044_vm1, %v3833_v36  ;;  %v3843_v40 = vadd.f32 %v3246_v37, %v3613_v10 }
 0x647   : > { %v3840_v39 = vadd.f32 %v3248_v38, %v3611_v9 }
 0x649   : > { %3063 = vmatprep.mubr.msk.f32.mxu1 %vm1044_vm1, %v3840_v39 }
 0x64a   : > { %3064 = vmatmul.mubr.msk.f32.gmra.mrb[62].mxu1 %vm1044_vm1, %v3843_v40 }
 0x701   : > { %v3044_v41 = vpop.f32.mrb[48].mxu1 }
 0x702   : > { %v3852_v44 = vadd.f32 %v3044_v41, %v2661_v24  ;;  %v2038_v47 = vpop.f32.mrb[49].mxu1 }
 0x703   : > { %v3854_v48 = vadd.f32 %v2661_v24, %v2038_v47 }
 0x704   : > { %v2120_v51 = vsel %vm310_vm0, %v3852_v44, -inf }
 0x705   : > { %2121 = vmax.xlane.f32.xlu1 %v2120_v51  ;;  %v3047_v52 = vpop.f32.mrb[50].mxu1  ;;  %v2117_v55 = vsel %vm310_vm0, %v3854_v48, -inf }
 0x706   : > { %v3860_v59 = vadd.f32 %v3047_v52, %v2661_v24  ;;  %v2048_v63 = vpop.f32.mrb[51].mxu1  ;;  %2118 = vmax.xlane.f32.xlu0 %v2117_v55 }
 0x707   : > { %v3864_v3 = vadd.f32 %v2661_v24, %v2048_v63 }
 0x708   : > { %v2126_v0 = vsel %vm310_vm0, %v3860_v59, -inf }
 0x709   : > { %v3050_v4 = vpop.f32.mrb[52].mxu1  ;;  %v2123_v16 = vsel %vm310_vm0, %v3864_v3, -inf }
 0x70a   : > { %v2058_v7 = vpop.f32.mrb[53].mxu1  ;;  %2127 = vmax.xlane.f32.xlu0 %v2126_v0  ;;  %v3868_v13 = vadd.f32 %v3050_v4, %v2661_v24 }
 0x70b   : > { %v3866_v11 = vadd.f32 %v2661_v24, %v2058_v7 }
 0x70c   : > { %v2132_v26 = vsel %vm310_vm0, %v3868_v13, -inf }
 0x70d   : > { %v3053_v14 = vpop.f32.mrb[54].mxu1  ;;  %v2129_v15 = vsel %vm310_vm0, %v3866_v11, -inf }
 0x70e   : > { %v2068_v17 = vpop.f32.mrb[55].mxu1  ;;  %2130 = vmax.xlane.f32.xlu1 %v2129_v15  ;;  %2124 = vmax.xlane.f32.xlu0 %v2123_v16  ;;  %v3876_v21 = vadd.f32 %v3053_v14, %v2661_v24 }
 0x70f   : > { %v3874_v19 = vadd.f32 %v2661_v24, %v2068_v17 }
 0x710   : > { %v2138_v37 = vsel %vm310_vm0, %v3876_v21, -inf }
 0x711   : > { %v3056_v22 = vpop.f32.mrb[56].mxu1  ;;  %v2135_v25 = vsel %vm310_vm0, %v3874_v19, -inf }
 0x712   : > { %v2078_v27 = vpop.f32.mrb[57].mxu1  ;;  %2136 = vmax.xlane.f32.xlu1 %v2135_v25  ;;  %2133 = vmax.xlane.f32.xlu0 %v2132_v26  ;;  %v3884_v31 = vadd.f32 %v3056_v22, %v2661_v24 }
 0x713   : > { %v3882_v30 = vadd.f32 %v2661_v24, %v2078_v27 }
 0x714   : > { %v2144_v55 = vsel %vm310_vm0, %v3884_v31, -inf }
 0x715   : > { %v3059_v33 = vpop.f32.mrb[58].mxu1  ;;  %v2141_v34 = vsel %vm310_vm0, %v3882_v30, -inf }
 0x716   : > { %v2088_v38 = vpop.f32.mrb[59].mxu1  ;;  %2142 = vmax.xlane.f32.xlu1 %v2141_v34  ;;  %2139 = vmax.xlane.f32.xlu0 %v2138_v37  ;;  %v3892_v47 = vadd.f32 %v3059_v33, %v2661_v24 }
 0x717   : > { %v3890_v41 = vadd.f32 %v2661_v24, %v2088_v38 }
 0x718   : > { %v2150_v15 = vsel %vm310_vm0, %v3892_v47, -inf }
 0x719   : > { %v3062_v51 = vpop.f32.mrb[60].mxu1  ;;  %v2147_v52 = vsel %vm310_vm0, %v3890_v41, -inf }
 0x71a   : > { %v2098_v63 = vpop.f32.mrb[61].mxu1  ;;  %2148 = vmax.xlane.f32.xlu1 %v2147_v52  ;;  %2145 = vmax.xlane.f32.xlu0 %v2144_v55  ;;  %v3900_v4 = vadd.f32 %v3062_v51, %v2661_v24 }
 0x71b   : > { %v3898_v0 = vadd.f32 %v2661_v24, %v2098_v63 }
 0x71c   : > { %v2156_v25 = vsel %vm310_vm0, %v3900_v4, -inf }
 0x71d   : > { %v3065_v7 = vpop.f32.mrb[62].mxu1  ;;  %v2153_v14 = vsel %vm310_vm0, %v3898_v0, -inf }
 0x71e   : > { %2154 = vmax.xlane.f32.xlu1 %v2153_v14  ;;  %2151 = vmax.xlane.f32.xlu0 %v2150_v15  ;;  %v2108_v16 = vpop.f32.mrb[63].mxu1  ;;  %v3908_v22 = vadd.f32 %v3065_v7, %v2661_v24 }
 0x71f   : > { %v3906_v17 = vadd.f32 %v2661_v24, %v2108_v16 }
 0x720   : > { %v2162_v26 = vsel %vm310_vm0, %v3908_v22, -inf }
 0x721   : > { %v2159_v27 = vsel %vm310_vm0, %v3906_v17, -inf }
 0x722   : > { %2157 = vmax.xlane.f32.xlu0 %v2156_v25 }
 0x726   : > { %2163 = vmax.xlane.f32.xlu0 %v2162_v26 }
 0x72f   : > { %2293 = vrot.lane.b32.xlu1 %v3762_v42, %s3322_s30 }
 0x753   : > { %2160 = vmax.xlane.f32.xlu1 %v2159_v27 }
 0x792   : > { %v2122_v33 = vpop.xlane.xlu1 %2121 }
 0x793   : > { %v2166_v24 = vsub.f32 %v3852_v44, %v2122_v33  ;;  %v2119_v34 = vpop.xlane.xlu0 %2118 }
 0x794   : > { %v2165_v37 = vsub.f32 %v3854_v48, %v2119_v34 }
 0x795   : > { %v2183_v38 = vmul.f32 1.442695, %v2166_v24 }
 0x796   : > { %v2181_v51 = vmul.f32 1.442695, %v2165_v37 }
 0x797   : > { %3249 = vpow2.f32 %v2183_v38  ;;  %v2128_v52 = vpop.xlane.xlu0 %2127 }
 0x798   : > { %3251 = vpow2.f32 %v2181_v51  ;;  %v2168_v55 = vsub.f32 %v3860_v59, %v2128_v52 }
 0x79a   : > { %v2187_v63 = vmul.f32 1.442695, %v2168_v55 }
 0x79b   : > { %v2131_v7 = vpop.xlane.xlu1 %2130  ;;  %v2125_v42 = vpop.xlane.xlu0 %2124 }
 0x79c   : > { %3253 = vpow2.f32 %v2187_v63  ;;  %v2169_v14 = vsub.f32 %v3866_v11, %v2131_v7  ;;  %v2167_v15 = vsub.f32 %v3864_v3, %v2125_v42 }
 0x79e   : > { %v2185_v16 = vmul.f32 1.442695, %v2167_v15  ;;  %v2189_v44 = vmul.f32 1.442695, %v2169_v14 }
 0x79f   : > { %v2137_v25 = vpop.xlane.xlu1 %2136  ;;  %v2134_v26 = vpop.xlane.xlu0 %2133 }
 0x7a0   : > { %v2171_v48 = vsub.f32 %v3874_v19, %v2137_v25  ;;  %v2170_v27 = vsub.f32 %v3868_v13, %v2134_v26  ;;  %3255 = vpow2.f32 %v2185_v16 }
 0x7a1   : > { %v3925_v33 = vpop.eup %3249  ;;  %3257 = vpow2.f32 %v2189_v44 }
 0x7a2   : > { %v3927_v59 = vpop.eup %3251  ;;  %v2191_v24 = vmul.f32 1.442695, %v2170_v27  ;;  %v2216_v34 = vsel %vm310_vm0, %v3925_v33, 0.0  ;;  %v2193_v11 = vmul.f32 1.442695, %v2171_v48 }
 0x7a3   : > { %v2143_v3 = vpop.xlane.xlu1 %2142  ;;  %v2140_v37 = vpop.xlane.xlu0 %2139  ;;  %2217 = vadd.xlane.f32.xlu0 %v2216_v34  ;;  %v2213_v38 = vsel %vm310_vm0, %v3927_v59, 0.0 }
 0x7a4   : > { %v2173_v19 = vsub.f32 %v3882_v30, %v2143_v3  ;;  %v2172_v13 = vsub.f32 %v3876_v21, %v2140_v37  ;;  %2214 = vadd.xlane.f32.xlu1 %v2213_v38  ;;  %3259 = vpow2.f32 %v2191_v24 }
 0x7a5   : > { %3261 = vpow2.f32 %v2193_v11 }
 0x7a6   : > { %v3935_v51 = vpop.eup %3253  ;;  %v2195_v52 = vmul.f32 1.442695, %v2172_v13  ;;  %v2197_v55 = vmul.f32 1.442695, %v2173_v19 }
 0x7a7   : > { %v2149_v63 = vpop.xlane.xlu1 %2148  ;;  %v2146_v7 = vpop.xlane.xlu0 %2145  ;;  %v2222_v42 = vsel %vm310_vm0, %v3935_v51, 0.0 }
 0x7a8   : > { %v2175_v14 = vsub.f32 %v3890_v41, %v2149_v63  ;;  %v2174_v15 = vsub.f32 %v3884_v31, %v2146_v7  ;;  %2223 = vadd.xlane.f32.xlu0 %v2222_v42  ;;  %3263 = vpow2.f32 %v2195_v52 }
 0x7a9   : > { %3265 = vpow2.f32 %v2197_v55 }
 0x7aa   : > { %v2199_v30 = vmul.f32 1.442695, %v2174_v15  ;;  %v3941_v21 = vpop.eup %3255  ;;  %v2201_v16 = vmul.f32 1.442695, %v2175_v14 }
 0x7ab   : > { %v2155_v44 = vpop.xlane.xlu1 %2154  ;;  %v2152_v25 = vpop.xlane.xlu0 %2151  ;;  %v2219_v27 = vsel %vm310_vm0, %v3941_v21, 0.0 }
 0x7ac   : > { %v2177_v26 = vsub.f32 %v3898_v0, %v2155_v44  ;;  %v2176_v48 = vsub.f32 %v3892_v47, %v2152_v25  ;;  %v3947_v24 = vpop.eup %3257  ;;  %3267 = vpow2.f32 %v2199_v30  ;;  %2220 = vadd.xlane.f32.xlu1 %v2219_v27 }
 0x7ad   : > { %3269 = vpow2.f32 %v2201_v16  ;;  %v2225_v47 = vsel %vm310_vm0, %v3947_v24, 0.0 }
 0x7ae   : > { %v2203_v31 = vmul.f32 1.442695, %v2176_v48  ;;  %v3949_v41 = vpop.eup %3259  ;;  %v2205_v34 = vmul.f32 1.442695, %v2177_v26 }
 0x7af   : > { %v2158_v11 = vpop.xlane.xlu0 %2157  ;;  %v2228_v0 = vsel %vm310_vm0, %v3949_v41, 0.0  ;;  %v3956_v37 = vpop.eup %3261 }
 0x7b0   : > { %v2178_v3 = vsub.f32 %v3900_v4, %v2158_v11  ;;  %3271 = vpow2.f32 %v2203_v31  ;;  %2229 = vadd.xlane.f32.xlu0 %v2228_v0  ;;  %2226 = vadd.xlane.f32.xlu1 %v2225_v47  ;;  %v2231_v55 = vsel %vm310_vm0, %v3956_v37, 0.0  ;;  %v3999_v11 = vpop.permute.xlu1 %2293 }
 0x7b1   : > { %3273 = vpow2.f32 %v2205_v34 }
 0x7b2   : > { %v2207_v38 = vmul.f32 1.442695, %v2178_v3  ;;  %v3958_v19 = vpop.eup %3263 }
 0x7b3   : > { %v2164_v13 = vpop.xlane.xlu0 %2163  ;;  %v2234_v4 = vsel %vm310_vm0, %v3958_v19, 0.0  ;;  %v3965_v63 = vpop.eup %3265 }
 0x7b4   : > { %3275 = vpow2.f32 %v2207_v38  ;;  %v2180_v52 = vsub.f32 %v3908_v22, %v2164_v13  ;;  %2235 = vadd.xlane.f32.xlu0 %v2234_v4  ;;  %2232 = vadd.xlane.f32.xlu1 %v2231_v55  ;;  %v2237_v22 = vsel %vm310_vm0, %v3965_v63, 0.0 }
 0x7b6   : > { %v2211_v7 = vmul.f32 1.442695, %v2180_v52  ;;  %v3967_v42 = vpop.eup %3267 }
 0x7b7   : > { %v2240_v14 = vsel %vm310_vm0, %v3967_v42, 0.0  ;;  %v3973_v15 = vpop.eup %3269 }
 0x7b8   : > { %3277 = vpow2.f32 %v2211_v7  ;;  %2241 = vadd.xlane.f32.xlu0 %v2240_v14  ;;  %2238 = vadd.xlane.f32.xlu1 %v2237_v22  ;;  %v2243_v44 = vsel %vm310_vm0, %v3973_v15, 0.0 }
 0x7ba   : > { %v3975_v30 = vpop.eup %3271 }
 0x7bb   : > { %v2246_v16 = vsel %vm310_vm0, %v3975_v30, 0.0  ;;  %v3981_v25 = vpop.eup %3273 }
 0x7bc   : > { %2247 = vadd.xlane.f32.xlu0 %v2246_v16  ;;  %2244 = vadd.xlane.f32.xlu1 %v2243_v44  ;;  %v2249_v27 = vsel %vm310_vm0, %v3981_v25, 0.0 }
 0x7be   : > { %v3983_v26 = vpop.eup %3275 }
 0x7bf   : > { %v2252_v48 = vsel %vm310_vm0, %v3983_v26, 0.0 }
 0x7c0   : > { %2253 = vadd.xlane.f32.xlu0 %v2252_v48  ;;  %2250 = vadd.xlane.f32.xlu1 %v2249_v27 }
 0x7c2   : > { %v3989_v31 = vpop.eup %3277 }
 0x7c3   : > { %v2258_v34 = vsel %vm310_vm0, %v3989_v31, 0.0 }
 0x7c4   : > { %2259 = vadd.xlane.f32.xlu0 %v2258_v34 }
 0x7d1   : > { %2297 = vrot.lane.b32.xlu1 %v3774_v56, %s3322_s30 }
 0x7d5   : > { %2299 = vrot.lane.b32.xlu1 %v3777_v60, %s3322_s30 }
 0x7da   : > { %2295 = vrot.lane.b32.xlu0 %v3765_v43, %s3322_s30 }
 0x7de   : > { %2301 = vrot.lane.b32.xlu0 %v3786_v8, %s3322_s30 }
 0x7e0   : > { %v2161_v3 = vpop.xlane.xlu1 %2160 }
 0x7e1   : > { %v2179_v0 = vsub.f32 %v3906_v17, %v2161_v3 }
 0x7e2   : > { %2305 = vrot.lane.b32.xlu0 %v3798_v18, %s3322_s30 }
 0x7e3   : > { %v2209_v56 = vmul.f32 1.442695, %v2179_v0 }
 0x7e5   : > { %3279 = vpow2.f32 %v2209_v56 }
 0x7e6   : > { %2309 = vrot.lane.b32.xlu0 %v3810_v28, %s3322_s30 }
 0x7ea   : > { %2313 = vrot.lane.b32.xlu0 %v3820_v23, %s3322_s30 }
 0x7ee   : > { %2317 = vrot.lane.b32.xlu0 %v3830_v35, %s3322_s30 }
 0x7ef   : > { %v4014_v43 = vpop.eup %3279 }
 0x7f0   : > { %v2255_v60 = vsel %vm310_vm0, %v4014_v43, 0.0 }
 0x7f2   : > { %2321 = vrot.lane.b32.xlu0 %v3840_v39, %s3322_s30 }
 0x7f9   : > { %2256 = vadd.xlane.f32.xlu1 %v2255_v60 }
 0x80a   : > { %2303 = vrot.lane.b32.xlu1 %v3789_v12, %s3322_s30 }
 0x80e   : > { %2307 = vrot.lane.b32.xlu1 %v3801_v20, %s3322_s30 }
 0x812   : > { %2311 = vrot.lane.b32.xlu1 %v3813_v29, %s3322_s30 }
 0x816   : > { %2315 = vrot.lane.b32.xlu1 %v3823_v32, %s3322_s30 }
 0x81a   : > { %2319 = vrot.lane.b32.xlu1 %v3833_v36, %s3322_s30 }
 0x81e   : > { %2323 = vrot.lane.b32.xlu1 %v3843_v40, %s3322_s30 }
 0x830   : > { %v2218_v8 = vpop.xlane.xlu0 %2217 }
 0x831   : > { %3281 = vrcp.f32 %v2218_v8  ;;  %v2215_v18 = vpop.xlane.xlu1 %2214 }
 0x832   : > { %3283 = vrcp.f32 %v2215_v18 }
 0x835   : > { %v2224_v12 = vpop.xlane.xlu0 %2223 }
 0x836   : > { %3285 = vrcp.f32 %v2224_v12 }
 0x839   : > { %v2221_v28 = vpop.xlane.xlu1 %2220 }
 0x83a   : > { %3287 = vrcp.f32 %v2221_v28 }
 0x83b   : > { %v3282_v20 = vpop.eup %3281 }
 0x83c   : > { %v3284_v23 = vpop.eup %3283  ;;  %v2264_v29 = vmul.f32 %v3282_v20, %v3925_v33 }
 0x83d   : > { %v2262_v32 = vmul.f32 %v3284_v23, %v3927_v59  ;;  %v2230_v35 = vpop.xlane.xlu0 %2229  ;;  %v2227_v39 = vpop.xlane.xlu1 %2226 }
 0x83e   : > { %2359 = vrot.lane.b32.xlu1 %v2264_v29, %s3323_s8  ;;  %3289 = vrcp.f32 %v2230_v35 }
 0x83f   : > { %2357 = vrot.lane.b32.xlu0 %v2262_v32, %s3323_s8  ;;  %3291 = vrcp.f32 %v2227_v39 }
 0x840   : > { %v3286_v36 = vpop.eup %3285 }
 0x841   : > { %v2268_v40 = vmul.f32 %v3286_v36, %v3935_v51  ;;  %v2236_v17 = vpop.xlane.xlu0 %2235  ;;  %v2233_v47 = vpop.xlane.xlu1 %2232 }
 0x842   : > { %3293 = vrcp.f32 %v2236_v17 }
 0x843   : > { %2363 = vrot.lane.b32.xlu1 %v2268_v40, %s3323_s8  ;;  %3295 = vrcp.f32 %v2233_v47 }
 0x844   : > { %v3288_v33 = vpop.eup %3287 }
 0x845   : > { %v2242_v59 = vpop.xlane.xlu0 %2241  ;;  %v2239_v38 = vpop.xlane.xlu1 %2238  ;;  %v2266_v13 = vmul.f32 %v3288_v33, %v3941_v21 }
 0x846   : > { %3297 = vrcp.f32 %v2242_v59 }
 0x847   : > { %3299 = vrcp.f32 %v2239_v38  ;;  %2361 = vrot.lane.b32.xlu0 %v2266_v13, %s3323_s8 }
 0x848   : > { %v3290_v52 = vpop.eup %3289 }
 0x849   : > { %v3292_v4 = vpop.eup %3291  ;;  %v2248_v55 = vpop.xlane.xlu0 %2247  ;;  %v2272_v51 = vmul.f32 %v3290_v52, %v3949_v41  ;;  %v2405_v52 = vsel %vm310_vm0, %v3555_v45, %v3999_v11 }
 0x84a   : > { %v2245_v7 = vpop.xlane.xlu1 %2244  ;;  %3301 = vrcp.f32 %v2248_v55  ;;  %v2270_v14 = vmul.f32 %v3292_v4, %v3947_v24 }
 0x84b   : > { %3303 = vrcp.f32 %v2245_v7  ;;  %2367 = vrot.lane.b32.xlu1 %v2272_v51, %s3323_s8 }
 0x84c   : > { %v3294_v22 = vpop.eup %3293  ;;  %2365 = vrot.lane.b32.xlu0 %v2270_v14, %s3323_s8 }
 0x84d   : > { %v3296_v21 = vpop.eup %3295  ;;  %v2254_v16 = vpop.xlane.xlu0 %2253  ;;  %v2276_v48 = vmul.f32 %v3294_v22, %v3958_v19 }
 0x84e   : > { %v2251_v44 = vpop.xlane.xlu1 %2250  ;;  %3305 = vrcp.f32 %v2254_v16  ;;  %v2274_v27 = vmul.f32 %v3296_v21, %v3956_v37 }
 0x84f   : > { %3307 = vrcp.f32 %v2251_v44  ;;  %2371 = vrot.lane.b32.xlu1 %v2276_v48, %s3323_s8 }
 0x850   : > { %v3298_v41 = vpop.eup %3297  ;;  %2369 = vrot.lane.b32.xlu0 %v2274_v27, %s3323_s8 }
 0x851   : > { %v3300_v24 = vpop.eup %3299  ;;  %v2260_v34 = vpop.xlane.xlu0 %2259  ;;  %v2280_v3 = vmul.f32 %v3298_v41, %v3967_v42 }
 0x852   : > { %3309 = vrcp.f32 %v2260_v34  ;;  %v2278_v0 = vmul.f32 %v3300_v24, %v3965_v63 }
 0x853   : > { %2375 = vrot.lane.b32.xlu1 %v2280_v3, %s3323_s8 }
 0x854   : > { %v3302_v56 = vpop.eup %3301  ;;  %2373 = vrot.lane.b32.xlu0 %v2278_v0, %s3323_s8 }
 0x855   : > { %v3304_v19 = vpop.eup %3303  ;;  %v2284_v37 = vmul.f32 %v3302_v56, %v3975_v30  ;;  %v2296_v23 = vpop.permute.xlu0 %2295 }
 0x856   : > { %v2282_v60 = vmul.f32 %v3304_v19, %v3973_v15  ;;  %v2298_v15 = vpop.permute.xlu1 %2297 }
 0x857   : > { %2379 = vrot.lane.b32.xlu1 %v2284_v37, %s3323_s8  ;;  %v2407_v11 = vsel %vm310_vm0, %v3563_v49, %v2298_v15 }
 0x858   : > { %v3306_v8 = vpop.eup %3305  ;;  %2377 = vrot.lane.b32.xlu0 %v2282_v60, %s3323_s8 }
 0x859   : > { %v3308_v18 = vpop.eup %3307  ;;  %v2288_v42 = vmul.f32 %v3306_v8, %v3983_v26  ;;  %v2302_v32 = vpop.permute.xlu0 %2301 }
 0x85a   : > { %v2286_v63 = vmul.f32 %v3308_v18, %v3981_v25  ;;  %v2300_v30 = vpop.permute.xlu1 %2299  ;;  %v2409_v41 = vsel %vm310_vm0, %v3571_v53, %v2302_v32 }
 0x85b   : > { %2383 = vrot.lane.b32.xlu1 %v2288_v42, %s3323_s8 }
 0x85c   : > { %v3310_v12 = vpop.eup %3309  ;;  %2381 = vrot.lane.b32.xlu0 %v2286_v63, %s3323_s8 }
 0x85d   : > { %v2292_v28 = vmul.f32 %v3310_v12, %v3989_v31  ;;  %v2306_v39 = vpop.permute.xlu0 %2305 }
 0x85e   : > { %v2411_v53 = vsel %vm310_vm0, %v3579_v57, %v2306_v39 }
 0x85f   : > { %2387 = vrot.lane.b32.xlu1 %v2292_v28, %s3323_s8 }
 0x861   : > { %v2310_v40 = vpop.permute.xlu0 %2309 }
 0x862   : > { %v2413_v57 = vsel %vm310_vm0, %v3587_v61, %v2310_v40 }
 0x865   : > { %v2314_v17 = vpop.permute.xlu0 %2313 }
 0x866   : > { %v2415_v61 = vsel %vm310_vm0, %v3595_v1, %v2314_v17 }
 0x869   : > { %v4064_v33 = vpop.permute.xlu0 %2317 }
 0x86a   : > { %v2417_v1 = vsel %vm310_vm0, %v3603_v5, %v4064_v33 }
 0x86d   : > { %v4068_v38 = vpop.permute.xlu0 %2321 }
 0x86e   : > { %v2419_v33 = vsel %vm310_vm0, %v3611_v9, %v4068_v38 }
 0x886   : > { %v2257_v20 = vpop.xlane.xlu1 %2256 }
 0x887   : > { %3311 = vrcp.f32 %v2257_v20 }
 0x88a   : > { %v2304_v29 = vpop.permute.xlu1 %2303 }
 0x88e   : > { %v2308_v35 = vpop.permute.xlu1 %2307 }
 0x88f   : > { %v2412_v56 = vsel %vm310_vm0, %v3581_v58, %v2308_v35 }
 0x891   : > { %v3312_v26 = vpop.eup %3311 }
 0x892   : > { %v2290_v25 = vmul.f32 %v3312_v26, %v4014_v43  ;;  %v2312_v36 = vpop.permute.xlu1 %2311  ;;  %v2406_v43 = vsel %vm310_vm0, %v3557_v46, %v2296_v23  ;;  %v2408_v46 = vsel %vm310_vm0, %v3565_v50, %v2300_v30  ;;  %v2410_v50 = vsel %vm310_vm0, %v3573_v54, %v2304_v29 }
 0x893   : > { %v2414_v58 = vsel %vm310_vm0, %v3589_v62, %v2312_v36 }
 0x894   : > { %2385 = vrot.lane.b32.xlu0 %v2290_v25, %s3323_s8 }
 0x896   : > { %v2316_v31 = vpop.permute.xlu1 %2315 }
 0x897   : > { %v2416_v62 = vsel %vm310_vm0, %v3597_v2, %v2316_v31 }
 0x89a   : > { %v4062_v47 = vpop.permute.xlu1 %2319 }
 0x89b   : > { %v2418_v2 = vsel %vm310_vm0, %v3605_v6, %v4062_v47 }
 0x89e   : > { %v4066_v59 = vpop.permute.xlu1 %2323 }
 0x89f   : > { %v2420_v6 = vsel %vm310_vm0, %v3613_v10, %v4066_v59 }
 0x8b0   : > { %v2360_v13 = vpop.permute.xlu1 %2359 }
 0x8b1   : > { %v2423_v4 = vsel %vm2421_vm2, %v2406_v43, %v2360_v13  ;;  %v2358_v55 = vpop.permute.xlu0 %2357 }
 0x8b2   : > { %v2440_v7 = vsel %vm2438_vm3, %v2423_v4, 0.0  ;;  %v2422_v51 = vsel %vm2421_vm2, %v2405_v52, %v2358_v55 }
 0x8b3   : > { %2456 = vst [vmem:[%s4075_s12 + $0x8] sm:$0xff] %v2440_v7  ;;  %v2439_v14 = vsel %vm2438_vm3, %v2422_v51, 0.0 }
 0x8b4   : > { %2455 = vst [vmem:[%s4075_s12] sm:$0xff] %v2439_v14 }
 0x8b5   : > { %v2364_v22 = vpop.permute.xlu1 %2363 }
 0x8b6   : > { %v2425_v21 = vsel %vm2421_vm2, %v2408_v46, %v2364_v22 }
 0x8b7   : > { %v2442_v45 = vsel %vm2438_vm3, %v2425_v21, 0.0 }
 0x8b8   : > { %2458 = vst [vmem:[%s4075_s12 + $0x18] sm:$0xff] %v2442_v45 }
 0x8b9   : > { %v2362_v16 = vpop.permute.xlu0 %2361 }
 0x8ba   : > { %v2424_v44 = vsel %vm2421_vm2, %v2407_v11, %v2362_v16 }
 0x8bb   : > { %v2441_v48 = vsel %vm2438_vm3, %v2424_v44, 0.0 }
 0x8bc   : > { %2457 = vst [vmem:[%s4075_s12 + $0x10] sm:$0xff] %v2441_v48 }
 0x8bd   : > { %v2368_v27 = vpop.permute.xlu1 %2367 }
 0x8be   : > { %v2366_v24 = vpop.permute.xlu0 %2365  ;;  %v2427_v34 = vsel %vm2421_vm2, %v2410_v50, %v2368_v27 }
 0x8bf   : > { %v2426_v49 = vsel %vm2421_vm2, %v2409_v41, %v2366_v24  ;;  %v2444_v3 = vsel %vm2438_vm3, %v2427_v34, 0.0 }
 0x8c0   : > { %v2443_v0 = vsel %vm2438_vm3, %v2426_v49, 0.0  ;;  %2460 = vst [vmem:[%s4075_s12 + $0x28] sm:$0xff] %v2444_v3 }
 0x8c1   : > { %2459 = vst [vmem:[%s4075_s12 + $0x20] sm:$0xff] %v2443_v0  ;;  %v2372_v54 = vpop.permute.xlu1 %2371 }
 0x8c2   : > { %v2370_v19 = vpop.permute.xlu0 %2369  ;;  %v2429_v37 = vsel %vm2421_vm2, %v2412_v56, %v2372_v54 }
 0x8c3   : > { %v2428_v60 = vsel %vm2421_vm2, %v2411_v53, %v2370_v19  ;;  %v2446_v8 = vsel %vm2438_vm3, %v2429_v37, 0.0 }
 0x8c4   : > { %v2445_v18 = vsel %vm2438_vm3, %v2428_v60, 0.0  ;;  %2462 = vst [vmem:[%s4075_s12 + $0x38] sm:$0xff] %v2446_v8 }
 0x8c5   : > { %2461 = vst [vmem:[%s4075_s12 + $0x30] sm:$0xff] %v2445_v18  ;;  %v2376_v42 = vpop.permute.xlu1 %2375 }
 0x8c6   : > { %v2374_v63 = vpop.permute.xlu0 %2373  ;;  %v2431_v12 = vsel %vm2421_vm2, %v2414_v58, %v2376_v42 }
 0x8c7   : > { %v2430_v28 = vsel %vm2421_vm2, %v2413_v57, %v2374_v63  ;;  %v2448_v15 = vsel %vm2438_vm3, %v2431_v12, 0.0 }
 0x8c8   : > { %v2447_v30 = vsel %vm2438_vm3, %v2430_v28, 0.0  ;;  %2464 = vst [vmem:[%s4075_s12 + $0x48] sm:$0xff] %v2448_v15 }
 0x8c9   : > { %2463 = vst [vmem:[%s4075_s12 + $0x40] sm:$0xff] %v2447_v30  ;;  %v2380_v20 = vpop.permute.xlu1 %2379 }
 0x8ca   : > { %v2378_v23 = vpop.permute.xlu0 %2377  ;;  %v2433_v29 = vsel %vm2421_vm2, %v2416_v62, %v2380_v20 }
 0x8cb   : > { %v2432_v32 = vsel %vm2421_vm2, %v2415_v61, %v2378_v23  ;;  %v2450_v26 = vsel %vm2438_vm3, %v2433_v29, 0.0 }
 0x8cc   : > { %v2449_v25 = vsel %vm2438_vm3, %v2432_v32, 0.0  ;;  %2466 = vst [vmem:[%s4075_s12 + $0x58] sm:$0xff] %v2450_v26 }
 0x8cd   : > { %2465 = vst [vmem:[%s4075_s12 + $0x50] sm:$0xff] %v2449_v25  ;;  %v2384_v35 = vpop.permute.xlu1 %2383 }
 0x8ce   : > { %v2382_v39 = vpop.permute.xlu0 %2381  ;;  %v2435_v36 = vsel %vm2421_vm2, %v2418_v2, %v2384_v35 }
 0x8cf   : > { %v2434_v40 = vsel %vm2421_vm2, %v2417_v1, %v2382_v39  ;;  %v2452_v31 = vsel %vm2438_vm3, %v2435_v36, 0.0 }
 0x8d0   : > { %v2451_v17 = vsel %vm2438_vm3, %v2434_v40, 0.0  ;;  %2468 = vst [vmem:[%s4075_s12 + $0x68] sm:$0xff] %v2452_v31 }
 0x8d1   : > { %2467 = vst [vmem:[%s4075_s12 + $0x60] sm:$0xff] %v2451_v17  ;;  %v2388_v47 = vpop.permute.xlu1 %2387 }
 0x8d2   : > { %v2437_v43 = vsel %vm2421_vm2, %v2420_v6, %v2388_v47 }
 0x8d3   : > { %v2454_v5 = vsel %vm2438_vm3, %v2437_v43, 0.0 }
 0x8d4   : > { %2470 = vst [vmem:[%s4075_s12 + $0x78] sm:$0xff] %v2454_v5 }
 0x906   : > { %v2386_v13 = vpop.permute.xlu0 %2385 }
 0x907   : > { %v2436_v52 = vsel %vm2421_vm2, %v2419_v33, %v2386_v13 }
 0x908   : > { %v2453_v4 = vsel %vm2438_vm3, %v2436_v52, 0.0 }
 0x909   : > { %2469 = vst [vmem:[%s4075_s12 + $0x70] sm:$0xff] %v2453_v4 }
 0x90a PF: > { %s17_s24 = sadd.s32 1, %s3319_s24  }
 0x90b   : > { %p14_p4 = scmp.ge.s32.totalorder %s17_s24, 4  }
 0x90d   :  { %16 = sbr.rel (!%p14_p4) target bundleno = 1 (0x1), region = 81 }

</bundles_post_ra>
